<compile_context>
chip_gen: v7x
topology: tpu7x:2x2x1
jax: 0.10.0
libtpu: 0.0.40
codegen_flags: <defaults>
</compile_context>

<pallas_src>
import functools

import jax
import jax.numpy as jnp
from jax.experimental import pallas as pl
from jax.experimental.pallas import tpu as pltpu


def _round_up(x, m):
    return ((x + m - 1) // m) * m


def _lstm_tag_kernel(x_ref, wih_ref, whh_ref, b_ref, wout_ref, bout_ref,
                     out_ref, hs_scr, *, seq_len, batch_pad, hidden_pad):
    """Single-invocation LSTM + hidden2tag.

    x_ref    : (S*Bp, Ep)      embeddings, flattened over time
    wih_ref  : (Ep, 4*Hp)      W_ih^T, gate blocks 128-lane aligned, zero-padded
    whh_ref  : (Hp, 4*Hp)      W_hh^T, same layout, padded rows zero
    b_ref    : (1, 4*Hp)       b_ih + b_hh, gate-block aligned
    wout_ref : (Hp, T)         hidden2tag weight^T, padded rows zero
    bout_ref : (1, T)
    out_ref  : (S*Bp, T)
    hs_scr   : (S*Bp, Hp)      VMEM scratch holding every h_t
    """
    Hp = hidden_pad
    Bp = batch_pad

    # Hoisted input projection for all timesteps at once (one big MXU matmul).
    xproj = (jnp.dot(x_ref[...], wih_ref[...], preferred_element_type=jnp.float32)
             + b_ref[...])
    whh = whh_ref[...]

    h = jnp.zeros((Bp, Hp), jnp.float32)
    c = jnp.zeros((Bp, Hp), jnp.float32)

    # Static unroll: seq_len is small; keeps the recurrence fully visible to
    # the scheduler and the carried state in vregs.
    for t in range(seq_len):
        lo = t * Bp
        gates = xproj[lo:lo + Bp, :] + jnp.dot(
            h, whh, preferred_element_type=jnp.float32)
        # PyTorch gate order [i, f, g, o]; each block is 128-lane aligned.
        i_g = jax.nn.sigmoid(gates[:, 0 * Hp:1 * Hp])
        f_g = jax.nn.sigmoid(gates[:, 1 * Hp:2 * Hp])
        g_g = jnp.tanh(gates[:, 2 * Hp:3 * Hp])
        o_g = jax.nn.sigmoid(gates[:, 3 * Hp:4 * Hp])
        c = f_g * c + i_g * g_g
        h = o_g * jnp.tanh(c)
        hs_scr[lo:lo + Bp, :] = h

    # Batched output projection: one matmul + one contiguous store.
    out_ref[...] = (jnp.dot(hs_scr[...], wout_ref[...],
                            preferred_element_type=jnp.float32)
                    + bout_ref[...]).astype(out_ref.dtype)


def _pack_gate_weights(w_t, in_dim, in_pad, H, H_pad):
    """(in_dim, 4H) -> (in_pad, 4*H_pad) with each gate block lane-aligned."""
    out = jnp.zeros((in_pad, 4 * H_pad), jnp.float32)
    for g in range(4):
        out = out.at[:in_dim, g * H_pad:g * H_pad + H].set(
            w_t[:, g * H:(g + 1) * H])
    return out


def _pack_gate_bias(b, H, H_pad):
    out = jnp.zeros((1, 4 * H_pad), jnp.float32)
    for g in range(4):
        out = out.at[0, g * H_pad:g * H_pad + H].set(b[g * H:(g + 1) * H])
    return out


def lstm_model_forward(nodes, emb_weights, w_ih, w_hh, b_ih, b_hh, w_out, b_out):
    """Forward pass matching LSTMModel.forward (minus the debug print)."""
    seq_len, batch = nodes.shape
    emb_dim = emb_weights.shape[1]
    hidden_dim = w_hh.shape[1]
    tagset_size = w_out.shape[0]

    B_pad = _round_up(batch, 8)         # full sublanes
    E_pad = _round_up(emb_dim, 128)     # clean MXU K tiles
    H_pad = _round_up(hidden_dim, 128)  # 128-lane-aligned gate blocks
    SB = seq_len * B_pad

    # Glue: embedding gather (nn.Embedding.from_pretrained), then pad & flatten.
    embds = emb_weights[nodes].astype(jnp.float32)            # (S, B, E)
    embds = jnp.pad(embds, ((0, 0), (0, B_pad - batch), (0, E_pad - emb_dim)))
    x_flat = embds.reshape(SB, E_pad)                          # (S*Bp, Ep)

    # Weight prep: kernel uses x @ W^T layout; pad + gate-align (zeros elsewhere
    # guarantee padded lanes contribute nothing to the real outputs).
    wih_t = _pack_gate_weights(jnp.transpose(w_ih), emb_dim, E_pad,
                               hidden_dim, H_pad)              # (Ep, 4Hp)
    whh_t = _pack_gate_weights(jnp.transpose(w_hh), hidden_dim, H_pad,
                               hidden_dim, H_pad)              # (Hp, 4Hp)
    bias = _pack_gate_bias(b_ih + b_hh, hidden_dim, H_pad)     # (1, 4Hp)
    wout_t = jnp.zeros((H_pad, tagset_size), jnp.float32).at[:hidden_dim, :].set(
        jnp.transpose(w_out))                                  # (Hp, T)
    bout = b_out.reshape(1, tagset_size).astype(jnp.float32)   # (1, T)

    kernel = functools.partial(_lstm_tag_kernel, seq_len=seq_len,
                               batch_pad=B_pad, hidden_pad=H_pad)

    out_flat = pl.pallas_call(
        kernel,
        out_shape=jax.ShapeDtypeStruct((SB, tagset_size), jnp.float32),
        grid_spec=pltpu.PrefetchScalarGridSpec(
            num_scalar_prefetch=0,
            grid=(1,),  # single invocation: whole recurrence lives in-kernel
            in_specs=[
                pl.BlockSpec((SB, E_pad), lambda i: (0, 0)),
                pl.BlockSpec((E_pad, 4 * H_pad), lambda i: (0, 0)),
                pl.BlockSpec((H_pad, 4 * H_pad), lambda i: (0, 0)),
                pl.BlockSpec((1, 4 * H_pad), lambda i: (0, 0)),
                pl.BlockSpec((H_pad, tagset_size), lambda i: (0, 0)),
                pl.BlockSpec((1, tagset_size), lambda i: (0, 0)),
            ],
            out_specs=pl.BlockSpec((SB, tagset_size), lambda i: (0, 0)),
            scratch_shapes=[
                pltpu.VMEM((SB, H_pad), jnp.float32),  # all hidden states
            ],
        ),
        compiler_params=pltpu.CompilerParams(
            dimension_semantics=("arbitrary",),
        ),
    )(x_flat, wih_t, whh_t, bias, wout_t, bout)

    # Strip batch padding; restore (S, B, T).
    return out_flat.reshape(seq_len, B_pad, tagset_size)[:, :batch, :]


def _reference_forward(nodes, emb_weights, w_ih, w_hh, b_ih, b_hh, w_out, b_out):
    """Pure-JAX reference mirroring torch semantics (for sanity check)."""
    embds = emb_weights[nodes]                       # (S, B, E)
    H = w_hh.shape[1]
    B = nodes.shape[1]

    def step(carry, x_t):
        h, c = carry
        gates = x_t @ w_ih.T + b_ih + h @ w_hh.T + b_hh
        i = jax.nn.sigmoid(gates[:, 0 * H:1 * H])
        f = jax.nn.sigmoid(gates[:, 1 * H:2 * H])
        g = jnp.tanh(gates[:, 2 * H:3 * H])
        o = jax.nn.sigmoid(gates[:, 3 * H:4 * H])
        c_new = f * c + i * g
        h_new = o * jnp.tanh(c_new)
        return (h_new, c_new), h_new

    init = (jnp.zeros((B, H), jnp.float32), jnp.zeros((B, H), jnp.float32))
    _, hs = jax.lax.scan(step, init, embds)
    return hs @ w_out.T + b_out


if __name__ == "__main__":
    # Module defaults: embedding_dim=100, hidden_dim=64, tagset_size=32
    vocab_size = 50
    embedding_dim = 100
    hidden_dim = 64
    tagset_size = 32
    seq_len = 8
    batch = 4

    key = jax.random.PRNGKey(0)
    k = jax.random.split(key, 8)

    # Deterministic synthetic parameters (shapes per nn.Embedding / nn.LSTM / nn.Linear)
    emb_weights = jax.random.normal(k[0], (vocab_size, embedding_dim), jnp.float32)
    scale = 1.0 / jnp.sqrt(hidden_dim)
    w_ih = jax.random.uniform(k[1], (4 * hidden_dim, embedding_dim), jnp.float32, -scale, scale)
    w_hh = jax.random.uniform(k[2], (4 * hidden_dim, hidden_dim), jnp.float32, -scale, scale)
    b_ih = jax.random.uniform(k[3], (4 * hidden_dim,), jnp.float32, -scale, scale)
    b_hh = jax.random.uniform(k[4], (4 * hidden_dim,), jnp.float32, -scale, scale)
    w_out = jax.random.uniform(k[5], (tagset_size, hidden_dim), jnp.float32, -scale, scale)
    b_out = jax.random.uniform(k[6], (tagset_size,), jnp.float32, -scale, scale)

    nodes = jax.random.randint(k[7], (seq_len, batch), 0, vocab_size, jnp.int32)

    tag_space = lstm_model_forward(nodes, emb_weights, w_ih, w_hh, b_ih, b_hh,
                                   w_out, b_out)
    tag_space = jax.block_until_ready(tag_space)

    ref = _reference_forward(nodes, emb_weights, w_ih, w_hh, b_ih, b_hh,
                             w_out, b_out)
    assert tag_space.shape == (seq_len, batch, tagset_size)
    assert jnp.max(jnp.abs(tag_space - ref)) < 1e-4

    print("KERNEL_OK")
</pallas_src>

<mosaic_0001>
module attributes {stable_mosaic.version = 11 : i64} {
  func.func @_lstm_tag_kernel(%arg0: i32, %arg1: memref<64x128xf32, #tpu.memory_space<vmem>>, %arg2: memref<128x512xf32, #tpu.memory_space<vmem>>, %arg3: memref<128x512xf32, #tpu.memory_space<vmem>>, %arg4: memref<1x512xf32, #tpu.memory_space<vmem>>, %arg5: memref<128x32xf32, #tpu.memory_space<vmem>>, %arg6: memref<1x32xf32, #tpu.memory_space<vmem>>, %arg7: memref<64x32xf32, #tpu.memory_space<vmem>>, %arg8: memref<64x128xf32, #tpu.memory_space<vmem>>) attributes {dimension_semantics = [#tpu.dimension_semantics<arbitrary>], iteration_bounds = array<i64: 1>, scalar_prefetch = 0 : i64, scratch_operands = 1 : i64, tpu.core_type = #tpu.core_type<tc>, window_params = [{pipeline_mode = #tpu.pipeline_mode<synchronous>, transform_indices = @transform_0, window_bounds = array<i64: 64, 128>}, {pipeline_mode = #tpu.pipeline_mode<synchronous>, transform_indices = @transform_1, window_bounds = array<i64: 128, 512>}, {pipeline_mode = #tpu.pipeline_mode<synchronous>, transform_indices = @transform_2, window_bounds = array<i64: 128, 512>}, {pipeline_mode = #tpu.pipeline_mode<synchronous>, transform_indices = @transform_3, window_bounds = array<i64: 1, 512>}, {pipeline_mode = #tpu.pipeline_mode<synchronous>, transform_indices = @transform_4, window_bounds = array<i64: 128, 32>}, {pipeline_mode = #tpu.pipeline_mode<synchronous>, transform_indices = @transform_5, window_bounds = array<i64: 1, 32>}, {pipeline_mode = #tpu.pipeline_mode<synchronous>, transform_indices = @transform_6, window_bounds = array<i64: 64, 32>}]} {
    %c0 = arith.constant 0 : index
    %c0_0 = arith.constant 0 : index
    %0 = vector.load %arg1[%c0, %c0_0] : memref<64x128xf32, #tpu.memory_space<vmem>>, vector<64x128xf32>
    %c0_1 = arith.constant 0 : index
    %c0_2 = arith.constant 0 : index
    %1 = vector.load %arg2[%c0_1, %c0_2] : memref<128x512xf32, #tpu.memory_space<vmem>>, vector<128x512xf32>
    %cst = arith.constant dense<0.000000e+00> : vector<64x512xf32>
    %2 = tpu.matmul %0, %1, %cst {dimension_numbers = #tpu.dot_dimension_numbers<[1], [0], [0], [1], [0, 0, 1, 1], [], []>} : vector<64x128xf32>, vector<128x512xf32>, vector<64x512xf32> -> vector<64x512xf32>
    %c0_3 = arith.constant 0 : index
    %c0_4 = arith.constant 0 : index
    %3 = vector.load %arg4[%c0_3, %c0_4] : memref<1x512xf32, #tpu.memory_space<vmem>>, vector<1x512xf32>
    %4 = vector.broadcast %3 : vector<1x512xf32> to vector<64x512xf32>
    %5 = arith.addf %2, %4 : vector<64x512xf32>
    %c0_5 = arith.constant 0 : index
    %c0_6 = arith.constant 0 : index
    %6 = vector.load %arg3[%c0_5, %c0_6] : memref<128x512xf32, #tpu.memory_space<vmem>>, vector<128x512xf32>
    %cst_7 = arith.constant 0.000000e+00 : f32
    %7 = vector.broadcast %cst_7 : f32 to vector<8x128xf32>
    %cst_8 = arith.constant 0.000000e+00 : f32
    %8 = vector.broadcast %cst_8 : f32 to vector<8x128xf32>
    %9 = vector.extract_strided_slice %5 {offsets = [0, 0], sizes = [8, 512], strides = [1, 1]} : vector<64x512xf32> to vector<8x512xf32>
    %cst_9 = arith.constant dense<0.000000e+00> : vector<8x512xf32>
    %10 = tpu.matmul %7, %6, %cst_9 {dimension_numbers = #tpu.dot_dimension_numbers<[1], [0], [0], [1], [0, 0, 1, 1], [], []>} : vector<8x128xf32>, vector<128x512xf32>, vector<8x512xf32> -> vector<8x512xf32>
    %11 = arith.addf %9, %10 : vector<8x512xf32>
    %12 = vector.extract_strided_slice %11 {offsets = [0, 0], sizes = [8, 128], strides = [1, 1]} : vector<8x512xf32> to vector<8x128xf32>
    %13 = arith.negf %12 : vector<8x128xf32>
    %14 = math.exp %13 : vector<8x128xf32>
    %cst_10 = arith.constant 1.000000e+00 : f32
    %15 = vector.broadcast %cst_10 : f32 to vector<8x128xf32>
    %16 = arith.addf %15, %14 : vector<8x128xf32>
    %17 = arith.divf %15, %16 : vector<8x128xf32>
    %18 = vector.extract_strided_slice %11 {offsets = [0, 128], sizes = [8, 128], strides = [1, 1]} : vector<8x512xf32> to vector<8x128xf32>
    %19 = arith.negf %18 : vector<8x128xf32>
    %20 = math.exp %19 : vector<8x128xf32>
    %cst_11 = arith.constant 1.000000e+00 : f32
    %21 = vector.broadcast %cst_11 : f32 to vector<8x128xf32>
    %22 = arith.addf %21, %20 : vector<8x128xf32>
    %23 = arith.divf %21, %22 : vector<8x128xf32>
    %24 = vector.extract_strided_slice %11 {offsets = [0, 256], sizes = [8, 128], strides = [1, 1]} : vector<8x512xf32> to vector<8x128xf32>
    %25 = math.tanh %24 : vector<8x128xf32>
    %26 = vector.extract_strided_slice %11 {offsets = [0, 384], sizes = [8, 128], strides = [1, 1]} : vector<8x512xf32> to vector<8x128xf32>
    %27 = arith.negf %26 : vector<8x128xf32>
    %28 = math.exp %27 : vector<8x128xf32>
    %cst_12 = arith.constant 1.000000e+00 : f32
    %29 = vector.broadcast %cst_12 : f32 to vector<8x128xf32>
    %30 = arith.addf %29, %28 : vector<8x128xf32>
    %31 = arith.divf %29, %30 : vector<8x128xf32>
    %32 = arith.mulf %23, %8 : vector<8x128xf32>
    %33 = arith.mulf %17, %25 : vector<8x128xf32>
    %34 = arith.addf %32, %33 : vector<8x128xf32>
    %35 = math.tanh %34 : vector<8x128xf32>
    %36 = arith.mulf %31, %35 : vector<8x128xf32>
    %c0_13 = arith.constant 0 : index
    %c0_14 = arith.constant 0 : index
    %37 = vector.load %arg8[%c0_13, %c0_14] : memref<64x128xf32, #tpu.memory_space<vmem>>, vector<8x128xf32>
    tpu.vector_store %arg8[%c0_13, %c0_14], %36 {strides = array<i32>} : memref<64x128xf32, #tpu.memory_space<vmem>>, vector<8x128xf32>,
    %38 = vector.extract_strided_slice %5 {offsets = [8, 0], sizes = [8, 512], strides = [1, 1]} : vector<64x512xf32> to vector<8x512xf32>
    %cst_15 = arith.constant dense<0.000000e+00> : vector<8x512xf32>
    %39 = tpu.matmul %36, %6, %cst_15 {dimension_numbers = #tpu.dot_dimension_numbers<[1], [0], [0], [1], [0, 0, 1, 1], [], []>} : vector<8x128xf32>, vector<128x512xf32>, vector<8x512xf32> -> vector<8x512xf32>
    %40 = arith.addf %38, %39 : vector<8x512xf32>
    %41 = vector.extract_strided_slice %40 {offsets = [0, 0], sizes = [8, 128], strides = [1, 1]} : vector<8x512xf32> to vector<8x128xf32>
    %42 = arith.negf %41 : vector<8x128xf32>
    %43 = math.exp %42 : vector<8x128xf32>
    %cst_16 = arith.constant 1.000000e+00 : f32
    %44 = vector.broadcast %cst_16 : f32 to vector<8x128xf32>
    %45 = arith.addf %44, %43 : vector<8x128xf32>
    %46 = arith.divf %44, %45 : vector<8x128xf32>
    %47 = vector.extract_strided_slice %40 {offsets = [0, 128], sizes = [8, 128], strides = [1, 1]} : vector<8x512xf32> to vector<8x128xf32>
    %48 = arith.negf %47 : vector<8x128xf32>
    %49 = math.exp %48 : vector<8x128xf32>
    %cst_17 = arith.constant 1.000000e+00 : f32
    %50 = vector.broadcast %cst_17 : f32 to vector<8x128xf32>
    %51 = arith.addf %50, %49 : vector<8x128xf32>
    %52 = arith.divf %50, %51 : vector<8x128xf32>
    %53 = vector.extract_strided_slice %40 {offsets = [0, 256], sizes = [8, 128], strides = [1, 1]} : vector<8x512xf32> to vector<8x128xf32>
    %54 = math.tanh %53 : vector<8x128xf32>
    %55 = vector.extract_strided_slice %40 {offsets = [0, 384], sizes = [8, 128], strides = [1, 1]} : vector<8x512xf32> to vector<8x128xf32>
    %56 = arith.negf %55 : vector<8x128xf32>
    %57 = math.exp %56 : vector<8x128xf32>
    %cst_18 = arith.constant 1.000000e+00 : f32
    %58 = vector.broadcast %cst_18 : f32 to vector<8x128xf32>
    %59 = arith.addf %58, %57 : vector<8x128xf32>
    %60 = arith.divf %58, %59 : vector<8x128xf32>
    %61 = arith.mulf %52, %34 : vector<8x128xf32>
    %62 = arith.mulf %46, %54 : vector<8x128xf32>
    %63 = arith.addf %61, %62 : vector<8x128xf32>
    %64 = math.tanh %63 : vector<8x128xf32>
    %65 = arith.mulf %60, %64 : vector<8x128xf32>
    %c8 = arith.constant 8 : index
    %c0_19 = arith.constant 0 : index
    %66 = vector.load %arg8[%c8, %c0_19] : memref<64x128xf32, #tpu.memory_space<vmem>>, vector<8x128xf32>
    tpu.vector_store %arg8[%c8, %c0_19], %65 {strides = array<i32>} : memref<64x128xf32, #tpu.memory_space<vmem>>, vector<8x128xf32>,
    %67 = vector.extract_strided_slice %5 {offsets = [16, 0], sizes = [8, 512], strides = [1, 1]} : vector<64x512xf32> to vector<8x512xf32>
    %cst_20 = arith.constant dense<0.000000e+00> : vector<8x512xf32>
    %68 = tpu.matmul %65, %6, %cst_20 {dimension_numbers = #tpu.dot_dimension_numbers<[1], [0], [0], [1], [0, 0, 1, 1], [], []>} : vector<8x128xf32>, vector<128x512xf32>, vector<8x512xf32> -> vector<8x512xf32>
    %69 = arith.addf %67, %68 : vector<8x512xf32>
    %70 = vector.extract_strided_slice %69 {offsets = [0, 0], sizes = [8, 128], strides = [1, 1]} : vector<8x512xf32> to vector<8x128xf32>
    %71 = arith.negf %70 : vector<8x128xf32>
    %72 = math.exp %71 : vector<8x128xf32>
    %cst_21 = arith.constant 1.000000e+00 : f32
    %73 = vector.broadcast %cst_21 : f32 to vector<8x128xf32>
    %74 = arith.addf %73, %72 : vector<8x128xf32>
    %75 = arith.divf %73, %74 : vector<8x128xf32>
    %76 = vector.extract_strided_slice %69 {offsets = [0, 128], sizes = [8, 128], strides = [1, 1]} : vector<8x512xf32> to vector<8x128xf32>
    %77 = arith.negf %76 : vector<8x128xf32>
    %78 = math.exp %77 : vector<8x128xf32>
    %cst_22 = arith.constant 1.000000e+00 : f32
    %79 = vector.broadcast %cst_22 : f32 to vector<8x128xf32>
    %80 = arith.addf %79, %78 : vector<8x128xf32>
    %81 = arith.divf %79, %80 : vector<8x128xf32>
    %82 = vector.extract_strided_slice %69 {offsets = [0, 256], sizes = [8, 128], strides = [1, 1]} : vector<8x512xf32> to vector<8x128xf32>
    %83 = math.tanh %82 : vector<8x128xf32>
    %84 = vector.extract_strided_slice %69 {offsets = [0, 384], sizes = [8, 128], strides = [1, 1]} : vector<8x512xf32> to vector<8x128xf32>
    %85 = arith.negf %84 : vector<8x128xf32>
    %86 = math.exp %85 : vector<8x128xf32>
    %cst_23 = arith.constant 1.000000e+00 : f32
    %87 = vector.broadcast %cst_23 : f32 to vector<8x128xf32>
    %88 = arith.addf %87, %86 : vector<8x128xf32>
    %89 = arith.divf %87, %88 : vector<8x128xf32>
    %90 = arith.mulf %81, %63 : vector<8x128xf32>
    %91 = arith.mulf %75, %83 : vector<8x128xf32>
    %92 = arith.addf %90, %91 : vector<8x128xf32>
    %93 = math.tanh %92 : vector<8x128xf32>
    %94 = arith.mulf %89, %93 : vector<8x128xf32>
    %c16 = arith.constant 16 : index
    %c0_24 = arith.constant 0 : index
    %95 = vector.load %arg8[%c16, %c0_24] : memref<64x128xf32, #tpu.memory_space<vmem>>, vector<8x128xf32>
    tpu.vector_store %arg8[%c16, %c0_24], %94 {strides = array<i32>} : memref<64x128xf32, #tpu.memory_space<vmem>>, vector<8x128xf32>,
    %96 = vector.extract_strided_slice %5 {offsets = [24, 0], sizes = [8, 512], strides = [1, 1]} : vector<64x512xf32> to vector<8x512xf32>
    %cst_25 = arith.constant dense<0.000000e+00> : vector<8x512xf32>
    %97 = tpu.matmul %94, %6, %cst_25 {dimension_numbers = #tpu.dot_dimension_numbers<[1], [0], [0], [1], [0, 0, 1, 1], [], []>} : vector<8x128xf32>, vector<128x512xf32>, vector<8x512xf32> -> vector<8x512xf32>
    %98 = arith.addf %96, %97 : vector<8x512xf32>
    %99 = vector.extract_strided_slice %98 {offsets = [0, 0], sizes = [8, 128], strides = [1, 1]} : vector<8x512xf32> to vector<8x128xf32>
    %100 = arith.negf %99 : vector<8x128xf32>
    %101 = math.exp %100 : vector<8x128xf32>
    %cst_26 = arith.constant 1.000000e+00 : f32
    %102 = vector.broadcast %cst_26 : f32 to vector<8x128xf32>
    %103 = arith.addf %102, %101 : vector<8x128xf32>
    %104 = arith.divf %102, %103 : vector<8x128xf32>
    %105 = vector.extract_strided_slice %98 {offsets = [0, 128], sizes = [8, 128], strides = [1, 1]} : vector<8x512xf32> to vector<8x128xf32>
    %106 = arith.negf %105 : vector<8x128xf32>
    %107 = math.exp %106 : vector<8x128xf32>
    %cst_27 = arith.constant 1.000000e+00 : f32
    %108 = vector.broadcast %cst_27 : f32 to vector<8x128xf32>
    %109 = arith.addf %108, %107 : vector<8x128xf32>
    %110 = arith.divf %108, %109 : vector<8x128xf32>
    %111 = vector.extract_strided_slice %98 {offsets = [0, 256], sizes = [8, 128], strides = [1, 1]} : vector<8x512xf32> to vector<8x128xf32>
    %112 = math.tanh %111 : vector<8x128xf32>
    %113 = vector.extract_strided_slice %98 {offsets = [0, 384], sizes = [8, 128], strides = [1, 1]} : vector<8x512xf32> to vector<8x128xf32>
    %114 = arith.negf %113 : vector<8x128xf32>
    %115 = math.exp %114 : vector<8x128xf32>
    %cst_28 = arith.constant 1.000000e+00 : f32
    %116 = vector.broadcast %cst_28 : f32 to vector<8x128xf32>
    %117 = arith.addf %116, %115 : vector<8x128xf32>
    %118 = arith.divf %116, %117 : vector<8x128xf32>
    %119 = arith.mulf %110, %92 : vector<8x128xf32>
    %120 = arith.mulf %104, %112 : vector<8x128xf32>
    %121 = arith.addf %119, %120 : vector<8x128xf32>
    %122 = math.tanh %121 : vector<8x128xf32>
    %123 = arith.mulf %118, %122 : vector<8x128xf32>
    %c24 = arith.constant 24 : index
    %c0_29 = arith.constant 0 : index
    %124 = vector.load %arg8[%c24, %c0_29] : memref<64x128xf32, #tpu.memory_space<vmem>>, vector<8x128xf32>
    tpu.vector_store %arg8[%c24, %c0_29], %123 {strides = array<i32>} : memref<64x128xf32, #tpu.memory_space<vmem>>, vector<8x128xf32>,
    %125 = vector.extract_strided_slice %5 {offsets = [32, 0], sizes = [8, 512], strides = [1, 1]} : vector<64x512xf32> to vector<8x512xf32>
    %cst_30 = arith.constant dense<0.000000e+00> : vector<8x512xf32>
    %126 = tpu.matmul %123, %6, %cst_30 {dimension_numbers = #tpu.dot_dimension_numbers<[1], [0], [0], [1], [0, 0, 1, 1], [], []>} : vector<8x128xf32>, vector<128x512xf32>, vector<8x512xf32> -> vector<8x512xf32>
    %127 = arith.addf %125, %126 : vector<8x512xf32>
    %128 = vector.extract_strided_slice %127 {offsets = [0, 0], sizes = [8, 128], strides = [1, 1]} : vector<8x512xf32> to vector<8x128xf32>
    %129 = arith.negf %128 : vector<8x128xf32>
    %130 = math.exp %129 : vector<8x128xf32>
    %cst_31 = arith.constant 1.000000e+00 : f32
    %131 = vector.broadcast %cst_31 : f32 to vector<8x128xf32>
    %132 = arith.addf %131, %130 : vector<8x128xf32>
    %133 = arith.divf %131, %132 : vector<8x128xf32>
    %134 = vector.extract_strided_slice %127 {offsets = [0, 128], sizes = [8, 128], strides = [1, 1]} : vector<8x512xf32> to vector<8x128xf32>
    %135 = arith.negf %134 : vector<8x128xf32>
    %136 = math.exp %135 : vector<8x128xf32>
    %cst_32 = arith.constant 1.000000e+00 : f32
    %137 = vector.broadcast %cst_32 : f32 to vector<8x128xf32>
    %138 = arith.addf %137, %136 : vector<8x128xf32>
    %139 = arith.divf %137, %138 : vector<8x128xf32>
    %140 = vector.extract_strided_slice %127 {offsets = [0, 256], sizes = [8, 128], strides = [1, 1]} : vector<8x512xf32> to vector<8x128xf32>
    %141 = math.tanh %140 : vector<8x128xf32>
    %142 = vector.extract_strided_slice %127 {offsets = [0, 384], sizes = [8, 128], strides = [1, 1]} : vector<8x512xf32> to vector<8x128xf32>
    %143 = arith.negf %142 : vector<8x128xf32>
    %144 = math.exp %143 : vector<8x128xf32>
    %cst_33 = arith.constant 1.000000e+00 : f32
    %145 = vector.broadcast %cst_33 : f32 to vector<8x128xf32>
    %146 = arith.addf %145, %144 : vector<8x128xf32>
    %147 = arith.divf %145, %146 : vector<8x128xf32>
    %148 = arith.mulf %139, %121 : vector<8x128xf32>
    %149 = arith.mulf %133, %141 : vector<8x128xf32>
    %150 = arith.addf %148, %149 : vector<8x128xf32>
    %151 = math.tanh %150 : vector<8x128xf32>
    %152 = arith.mulf %147, %151 : vector<8x128xf32>
    %c32 = arith.constant 32 : index
    %c0_34 = arith.constant 0 : index
    %153 = vector.load %arg8[%c32, %c0_34] : memref<64x128xf32, #tpu.memory_space<vmem>>, vector<8x128xf32>
    tpu.vector_store %arg8[%c32, %c0_34], %152 {strides = array<i32>} : memref<64x128xf32, #tpu.memory_space<vmem>>, vector<8x128xf32>,
    %154 = vector.extract_strided_slice %5 {offsets = [40, 0], sizes = [8, 512], strides = [1, 1]} : vector<64x512xf32> to vector<8x512xf32>
    %cst_35 = arith.constant dense<0.000000e+00> : vector<8x512xf32>
    %155 = tpu.matmul %152, %6, %cst_35 {dimension_numbers = #tpu.dot_dimension_numbers<[1], [0], [0], [1], [0, 0, 1, 1], [], []>} : vector<8x128xf32>, vector<128x512xf32>, vector<8x512xf32> -> vector<8x512xf32>
    %156 = arith.addf %154, %155 : vector<8x512xf32>
    %157 = vector.extract_strided_slice %156 {offsets = [0, 0], sizes = [8, 128], strides = [1, 1]} : vector<8x512xf32> to vector<8x128xf32>
    %158 = arith.negf %157 : vector<8x128xf32>
    %159 = math.exp %158 : vector<8x128xf32>
    %cst_36 = arith.constant 1.000000e+00 : f32
    %160 = vector.broadcast %cst_36 : f32 to vector<8x128xf32>
    %161 = arith.addf %160, %159 : vector<8x128xf32>
    %162 = arith.divf %160, %161 : vector<8x128xf32>
    %163 = vector.extract_strided_slice %156 {offsets = [0, 128], sizes = [8, 128], strides = [1, 1]} : vector<8x512xf32> to vector<8x128xf32>
    %164 = arith.negf %163 : vector<8x128xf32>
    %165 = math.exp %164 : vector<8x128xf32>
    %cst_37 = arith.constant 1.000000e+00 : f32
    %166 = vector.broadcast %cst_37 : f32 to vector<8x128xf32>
    %167 = arith.addf %166, %165 : vector<8x128xf32>
    %168 = arith.divf %166, %167 : vector<8x128xf32>
    %169 = vector.extract_strided_slice %156 {offsets = [0, 256], sizes = [8, 128], strides = [1, 1]} : vector<8x512xf32> to vector<8x128xf32>
    %170 = math.tanh %169 : vector<8x128xf32>
    %171 = vector.extract_strided_slice %156 {offsets = [0, 384], sizes = [8, 128], strides = [1, 1]} : vector<8x512xf32> to vector<8x128xf32>
    %172 = arith.negf %171 : vector<8x128xf32>
    %173 = math.exp %172 : vector<8x128xf32>
    %cst_38 = arith.constant 1.000000e+00 : f32
    %174 = vector.broadcast %cst_38 : f32 to vector<8x128xf32>
    %175 = arith.addf %174, %173 : vector<8x128xf32>
    %176 = arith.divf %174, %175 : vector<8x128xf32>
    %177 = arith.mulf %168, %150 : vector<8x128xf32>
    %178 = arith.mulf %162, %170 : vector<8x128xf32>
    %179 = arith.addf %177, %178 : vector<8x128xf32>
    %180 = math.tanh %179 : vector<8x128xf32>
    %181 = arith.mulf %176, %180 : vector<8x128xf32>
    %c40 = arith.constant 40 : index
    %c0_39 = arith.constant 0 : index
    %182 = vector.load %arg8[%c40, %c0_39] : memref<64x128xf32, #tpu.memory_space<vmem>>, vector<8x128xf32>
    tpu.vector_store %arg8[%c40, %c0_39], %181 {strides = array<i32>} : memref<64x128xf32, #tpu.memory_space<vmem>>, vector<8x128xf32>,
    %183 = vector.extract_strided_slice %5 {offsets = [48, 0], sizes = [8, 512], strides = [1, 1]} : vector<64x512xf32> to vector<8x512xf32>
    %cst_40 = arith.constant dense<0.000000e+00> : vector<8x512xf32>
    %184 = tpu.matmul %181, %6, %cst_40 {dimension_numbers = #tpu.dot_dimension_numbers<[1], [0], [0], [1], [0, 0, 1, 1], [], []>} : vector<8x128xf32>, vector<128x512xf32>, vector<8x512xf32> -> vector<8x512xf32>
    %185 = arith.addf %183, %184 : vector<8x512xf32>
    %186 = vector.extract_strided_slice %185 {offsets = [0, 0], sizes = [8, 128], strides = [1, 1]} : vector<8x512xf32> to vector<8x128xf32>
    %187 = arith.negf %186 : vector<8x128xf32>
    %188 = math.exp %187 : vector<8x128xf32>
    %cst_41 = arith.constant 1.000000e+00 : f32
    %189 = vector.broadcast %cst_41 : f32 to vector<8x128xf32>
    %190 = arith.addf %189, %188 : vector<8x128xf32>
    %191 = arith.divf %189, %190 : vector<8x128xf32>
    %192 = vector.extract_strided_slice %185 {offsets = [0, 128], sizes = [8, 128], strides = [1, 1]} : vector<8x512xf32> to vector<8x128xf32>
    %193 = arith.negf %192 : vector<8x128xf32>
    %194 = math.exp %193 : vector<8x128xf32>
    %cst_42 = arith.constant 1.000000e+00 : f32
    %195 = vector.broadcast %cst_42 : f32 to vector<8x128xf32>
    %196 = arith.addf %195, %194 : vector<8x128xf32>
    %197 = arith.divf %195, %196 : vector<8x128xf32>
    %198 = vector.extract_strided_slice %185 {offsets = [0, 256], sizes = [8, 128], strides = [1, 1]} : vector<8x512xf32> to vector<8x128xf32>
    %199 = math.tanh %198 : vector<8x128xf32>
    %200 = vector.extract_strided_slice %185 {offsets = [0, 384], sizes = [8, 128], strides = [1, 1]} : vector<8x512xf32> to vector<8x128xf32>
    %201 = arith.negf %200 : vector<8x128xf32>
    %202 = math.exp %201 : vector<8x128xf32>
    %cst_43 = arith.constant 1.000000e+00 : f32
    %203 = vector.broadcast %cst_43 : f32 to vector<8x128xf32>
    %204 = arith.addf %203, %202 : vector<8x128xf32>
    %205 = arith.divf %203, %204 : vector<8x128xf32>
    %206 = arith.mulf %197, %179 : vector<8x128xf32>
    %207 = arith.mulf %191, %199 : vector<8x128xf32>
    %208 = arith.addf %206, %207 : vector<8x128xf32>
    %209 = math.tanh %208 : vector<8x128xf32>
    %210 = arith.mulf %205, %209 : vector<8x128xf32>
    %c48 = arith.constant 48 : index
    %c0_44 = arith.constant 0 : index
    %211 = vector.load %arg8[%c48, %c0_44] : memref<64x128xf32, #tpu.memory_space<vmem>>, vector<8x128xf32>
    tpu.vector_store %arg8[%c48, %c0_44], %210 {strides = array<i32>} : memref<64x128xf32, #tpu.memory_space<vmem>>, vector<8x128xf32>,
    %212 = vector.extract_strided_slice %5 {offsets = [56, 0], sizes = [8, 512], strides = [1, 1]} : vector<64x512xf32> to vector<8x512xf32>
    %cst_45 = arith.constant dense<0.000000e+00> : vector<8x512xf32>
    %213 = tpu.matmul %210, %6, %cst_45 {dimension_numbers = #tpu.dot_dimension_numbers<[1], [0], [0], [1], [0, 0, 1, 1], [], []>} : vector<8x128xf32>, vector<128x512xf32>, vector<8x512xf32> -> vector<8x512xf32>
    %214 = arith.addf %212, %213 : vector<8x512xf32>
    %215 = vector.extract_strided_slice %214 {offsets = [0, 0], sizes = [8, 128], strides = [1, 1]} : vector<8x512xf32> to vector<8x128xf32>
    %216 = arith.negf %215 : vector<8x128xf32>
    %217 = math.exp %216 : vector<8x128xf32>
    %cst_46 = arith.constant 1.000000e+00 : f32
    %218 = vector.broadcast %cst_46 : f32 to vector<8x128xf32>
    %219 = arith.addf %218, %217 : vector<8x128xf32>
    %220 = arith.divf %218, %219 : vector<8x128xf32>
    %221 = vector.extract_strided_slice %214 {offsets = [0, 128], sizes = [8, 128], strides = [1, 1]} : vector<8x512xf32> to vector<8x128xf32>
    %222 = arith.negf %221 : vector<8x128xf32>
    %223 = math.exp %222 : vector<8x128xf32>
    %cst_47 = arith.constant 1.000000e+00 : f32
    %224 = vector.broadcast %cst_47 : f32 to vector<8x128xf32>
    %225 = arith.addf %224, %223 : vector<8x128xf32>
    %226 = arith.divf %224, %225 : vector<8x128xf32>
    %227 = vector.extract_strided_slice %214 {offsets = [0, 256], sizes = [8, 128], strides = [1, 1]} : vector<8x512xf32> to vector<8x128xf32>
    %228 = math.tanh %227 : vector<8x128xf32>
    %229 = vector.extract_strided_slice %214 {offsets = [0, 384], sizes = [8, 128], strides = [1, 1]} : vector<8x512xf32> to vector<8x128xf32>
    %230 = arith.negf %229 : vector<8x128xf32>
    %231 = math.exp %230 : vector<8x128xf32>
    %cst_48 = arith.constant 1.000000e+00 : f32
    %232 = vector.broadcast %cst_48 : f32 to vector<8x128xf32>
    %233 = arith.addf %232, %231 : vector<8x128xf32>
    %234 = arith.divf %232, %233 : vector<8x128xf32>
    %235 = arith.mulf %226, %208 : vector<8x128xf32>
    %236 = arith.mulf %220, %228 : vector<8x128xf32>
    %237 = arith.addf %235, %236 : vector<8x128xf32>
    %238 = math.tanh %237 : vector<8x128xf32>
    %239 = arith.mulf %234, %238 : vector<8x128xf32>
    %c56 = arith.constant 56 : index
    %c0_49 = arith.constant 0 : index
    %240 = vector.load %arg8[%c56, %c0_49] : memref<64x128xf32, #tpu.memory_space<vmem>>, vector<8x128xf32>
    tpu.vector_store %arg8[%c56, %c0_49], %239 {strides = array<i32>} : memref<64x128xf32, #tpu.memory_space<vmem>>, vector<8x128xf32>,
    %c0_50 = arith.constant 0 : index
    %c0_51 = arith.constant 0 : index
    %241 = vector.load %arg8[%c0_50, %c0_51] : memref<64x128xf32, #tpu.memory_space<vmem>>, vector<64x128xf32>
    %c0_52 = arith.constant 0 : index
    %c0_53 = arith.constant 0 : index
    %242 = vector.load %arg5[%c0_52, %c0_53] : memref<128x32xf32, #tpu.memory_space<vmem>>, vector<128x32xf32>
    %cst_54 = arith.constant dense<0.000000e+00> : vector<64x32xf32>
    %243 = tpu.matmul %241, %242, %cst_54 {dimension_numbers = #tpu.dot_dimension_numbers<[1], [0], [0], [1], [0, 0, 1, 1], [], []>} : vector<64x128xf32>, vector<128x32xf32>, vector<64x32xf32> -> vector<64x32xf32>
    %c0_55 = arith.constant 0 : index
    %c0_56 = arith.constant 0 : index
    %244 = vector.load %arg6[%c0_55, %c0_56] : memref<1x32xf32, #tpu.memory_space<vmem>>, vector<1x32xf32>
    %245 = vector.broadcast %244 : vector<1x32xf32> to vector<64x32xf32>
    %246 = arith.addf %243, %245 : vector<64x32xf32>
    %c0_57 = arith.constant 0 : index
    %c0_58 = arith.constant 0 : index
    %247 = vector.load %arg7[%c0_57, %c0_58] : memref<64x32xf32, #tpu.memory_space<vmem>>, vector<64x32xf32>
    tpu.vector_store %arg7[%c0_57, %c0_58], %246 {strides = array<i32>} : memref<64x32xf32, #tpu.memory_space<vmem>>, vector<64x32xf32>,
    return
  }
  func.func @transform_0(%arg0: i32) -> (i32, i32) {
    %c0_i32 = arith.constant 0 : i32
    %c0_i32_0 = arith.constant 0 : i32
    %c0_i32_1 = arith.constant 0 : i32
    return %c0_i32, %c0_i32_0 : i32, i32
  }
  func.func @transform_1(%arg0: i32) -> (i32, i32) {
    %c0_i32 = arith.constant 0 : i32
    %c0_i32_0 = arith.constant 0 : i32
    %c0_i32_1 = arith.constant 0 : i32
    return %c0_i32, %c0_i32_0 : i32, i32
  }
  func.func @transform_2(%arg0: i32) -> (i32, i32) {
    %c0_i32 = arith.constant 0 : i32
    %c0_i32_0 = arith.constant 0 : i32
    %c0_i32_1 = arith.constant 0 : i32
    return %c0_i32, %c0_i32_0 : i32, i32
  }
  func.func @transform_3(%arg0: i32) -> (i32, i32) {
    %c0_i32 = arith.constant 0 : i32
    %c0_i32_0 = arith.constant 0 : i32
    %c0_i32_1 = arith.constant 0 : i32
    return %c0_i32, %c0_i32_0 : i32, i32
  }
  func.func @transform_4(%arg0: i32) -> (i32, i32) {
    %c0_i32 = arith.constant 0 : i32
    %c0_i32_0 = arith.constant 0 : i32
    %c0_i32_1 = arith.constant 0 : i32
    return %c0_i32, %c0_i32_0 : i32, i32
  }
  func.func @transform_5(%arg0: i32) -> (i32, i32) {
    %c0_i32 = arith.constant 0 : i32
    %c0_i32_0 = arith.constant 0 : i32
    %c0_i32_1 = arith.constant 0 : i32
    return %c0_i32, %c0_i32_0 : i32, i32
  }
  func.func @transform_6(%arg0: i32) -> (i32, i32) {
    %c0_i32 = arith.constant 0 : i32
    %c0_i32_0 = arith.constant 0 : i32
    %c0_i32_1 = arith.constant 0 : i32
    return %c0_i32, %c0_i32_0 : i32, i32
  }
}

</mosaic_0001>

<bundles_post_ra>
// kernel: tpu_custom_call.1
= control target key start
LH: loop header
LB: loop body
LE: loop exit
PB: predicated region body
PF: predicated region fallthrough
CT: control target
= control target key end

     0   :  { %11 = vsyncpa [#allocation4], 0  ;;  %s3580_s0 = inlined_call_operand.vmem [shape: f32[64,128], index: 0, kind: input, shape index: {}]   ;;  %s3581_s1 = inlined_call_operand.hbm [shape: f32[128,512], index: 1, kind: input, shape index: {}]   ;;  %s3582_s2 = inlined_call_operand.hbm [shape: f32[128,512], index: 2, kind: input, shape index: {}]   ;;  %s3583_s3 = inlined_call_operand.vmem [shape: f32[1,512], index: 3, kind: input, shape index: {}]   ;;  %s3584_s4 = inlined_call_operand.vmem [shape: f32[128,32], index: 4, kind: input, shape index: {}]   ;;  %s3585_s5 = inlined_call_operand.vmem [shape: f32[1,32], index: 5, kind: input, shape index: {}]   ;;  %s3586_s6 = inlined_call_operand.vmem [shape: f32[64,32], index: 6, kind: output, shape index: {}]  }
   0x1   :  { %12 = vsyncpa [#allocation6], 0  ;;  %s2900_s21 = smov [#allocation3]   ;;  %s2852_s25 = scalar_lea.hbm %s3581_s1, 8192 }
   0x2   :  { %s20_s22 = sshll.u32 %s2900_s21, 4  ;;  %p2853_p0 = scmp.ne.s32.totalorder %s3581_s1, %s2852_s25  ;;  %s21_s22 = int_to_ptr.vmem [resolvable:$true] %s20_s22 }
   0x3   :  { %p2856_p1 = scmp.lt.u32.totalorder %s2852_s25, %s3581_s1 }
   0x5   :  { %p2858_p2 = pnand %p2856_p1, %p2853_p0 }
   0x7   :  { %2861 = shalt.err (!%p2858_p2)
}
   0x8   :  { %s2862_s30 = scalar_lea.vmem %s21_s22, 8192  ;;  %p2867_p4 = scmp.lt.s32.totalorder %s21_s22, %s21_s22 }
   0x9   :  { %p2863_p3 = scmp.ne.s32.totalorder %s21_s22, %s2862_s30  ;;  %p2868_p5 = scmp.lt.s32.totalorder %s2862_s30, %s2862_s30 }
   0xb   :  { %p2869_p6 = por %p2868_p5, %p2867_p4 }
   0xd   :  { %p2870_p7 = pnand %p2869_p6, %p2863_p3 }
   0xf   :  { %2873 = shalt.err (!%p2870_p7)
}
  0x10   :  { %s2901_s7 = smov 512   ;;  %s2902_s8 = smov 32  }
  0x11   :  { %26 = dma.hbm_to_vmem [thread:$0]  %s3581_s1, 8192, %s21_s22, [#allocation4], %s2901_s7, %s2901_s7, %s2902_s8  }
  0x12   :  { %s2903_s11 = smov [#allocation5]   ;;  %s2874_s15 = scalar_lea.hbm %s3582_s2, 8192 }
  0x13   :  { %s32_s12 = sshll.u32 %s2903_s11, 4  ;;  %p2875_p8 = scmp.ne.s32.totalorder %s3582_s2, %s2874_s15  ;;  %s33_s12 = int_to_ptr.vmem [resolvable:$true] %s32_s12 }
  0x14   :  { %p2878_p9 = scmp.lt.u32.totalorder %s2874_s15, %s3582_s2 }
  0x16   :  { %p2880_p10 = pnand %p2878_p9, %p2875_p8 }
  0x18   :  { %2883 = shalt.err (!%p2880_p10)
}
  0x19   :  { %s2884_s20 = scalar_lea.vmem %s33_s12, 8192  ;;  %p2889_p12 = scmp.lt.s32.totalorder %s33_s12, %s33_s12 }
  0x1a   :  { %p2885_p11 = scmp.ne.s32.totalorder %s33_s12, %s2884_s20  ;;  %p2890_p13 = scmp.lt.s32.totalorder %s2884_s20, %s2884_s20 }
  0x1c   :  { %p2891_p0 = por %p2890_p13, %p2889_p12 }
  0x1e   :  { %p2892_p1 = pnand %p2891_p0, %p2885_p11 }
  0x20   :  { %2895 = shalt.err (!%p2892_p1)
}
  0x21   :  { %38 = dma.hbm_to_vmem [thread:$0]  %s3582_s2, 8192, %s33_s12, [#allocation6], %s2901_s7, %s2901_s7, %s2902_s8  }
  0x22   :  { %2896 = dma.done.wait [#allocation4], 8192  }
  0x23   :  { %2897 = vsyncadd [#allocation4], 4294959104 }
  0x24   :  { %2898 = dma.done.wait [#allocation6], 8192  }
  0x25   :  { %2899 = vsyncadd [#allocation6], 4294959104  ;;  %v3587_v0 = vmov 0.0   ;;  %v60_v1 = vld [vmem:[#allocation3 + $0x8] sm:$0xff]  ;;  %v59_v3 = vld [vmem:[#allocation3] sm:$0xff]  ;;  %vm1939_vm0 = vcmask 261120  }
  0x26   :  { %209 = vmatprep.mubr.f32.mxu1 %v3587_v0  ;;  %499 = vmatprep.mubr.f32.mxu0 %v3587_v0  ;;  %v64_v2 = vld [vmem:[#allocation3 + $0x28] sm:$0xff]  ;;  %v63_v5 = vld [vmem:[#allocation3 + $0x20] sm:$0xff] }
  0x27   :  { %v2047_v4 = vpack.c.bf16 %v64_v2, %v60_v1  ;;  %v372_v6 = vld [vmem:[#allocation5 + $0x8] sm:$0xff]  ;;  %v2049_v8 = vpack.c.bf16 %v63_v5, %v59_v3  ;;  %v371_v10 = vld [vmem:[#allocation5] sm:$0xff] }
  0x28   :  { %v376_v7 = vld [vmem:[#allocation5 + $0x28] sm:$0xff]  ;;  %v375_v11 = vld [vmem:[#allocation5 + $0x20] sm:$0xff] }
  0x29   :  { %v2966_v9 = vpack.c.bf16 %v376_v7, %v372_v6  ;;  %v68_v12 = vld [vmem:[#allocation3 + $0x48] sm:$0xff]  ;;  %2048 = vmatprep.subr.bf16.mxu1 %v2047_v4  ;;  %v2968_v13 = vpack.c.bf16 %v375_v11, %v371_v10  ;;  %v67_v15 = vld [vmem:[#allocation3 + $0x40] sm:$0xff] }
  0x2a   :  { %v72_v14 = vld [vmem:[#allocation3 + $0x68] sm:$0xff]  ;;  %v71_v16 = vld [vmem:[#allocation3 + $0x60] sm:$0xff]  ;;  %2050 = vmatpush1.bf16.msra.mxu1 %v2049_v8 }
  0x2b   :  { %2112 = vmatprep.subr.bf16.mxu0 %v2966_v9  ;;  %v2051_v17 = vpack.c.bf16 %v72_v14, %v68_v12  ;;  %v2053_v18 = vpack.c.bf16 %v71_v16, %v67_v15  ;;  %v380_v19 = vld [vmem:[#allocation5 + $0x48] sm:$0xff]  ;;  %v379_v21 = vld [vmem:[#allocation5 + $0x40] sm:$0xff] }
  0x2c   :  { %v384_v20 = vld [vmem:[#allocation5 + $0x68] sm:$0xff]  ;;  %2114 = vmatpush1.bf16.msra.mxu0 %v2968_v13  ;;  %v383_v23 = vld [vmem:[#allocation5 + $0x60] sm:$0xff] }
  0x2d   :  { %v2972_v22 = vpack.c.bf16 %v384_v20, %v380_v19  ;;  %v76_v24 = vld [vmem:[#allocation3 + $0x88] sm:$0xff]  ;;  %2052 = vmatprep.subr.bf16.mxu1 %v2051_v17  ;;  %v2974_v26 = vpack.c.bf16 %v383_v23, %v379_v21  ;;  %v75_v28 = vld [vmem:[#allocation3 + $0x80] sm:$0xff] }
  0x2e   :  { %v80_v25 = vld [vmem:[#allocation3 + $0xa8] sm:$0xff]  ;;  %v79_v29 = vld [vmem:[#allocation3 + $0xa0] sm:$0xff]  ;;  %2054 = vmatpush1.bf16.msra.mxu1 %v2053_v18 }
  0x2f   :  { %v2055_v27 = vpack.c.bf16 %v80_v25, %v76_v24  ;;  %v388_v30 = vld [vmem:[#allocation5 + $0x88] sm:$0xff]  ;;  %2116 = vmatprep.subr.bf16.mxu0 %v2972_v22  ;;  %v387_v32 = vld [vmem:[#allocation5 + $0x80] sm:$0xff]  ;;  %v2057_v34 = vpack.c.bf16 %v79_v29, %v75_v28 }
  0x30   :  { %v392_v31 = vld [vmem:[#allocation5 + $0xa8] sm:$0xff]  ;;  %v391_v33 = vld [vmem:[#allocation5 + $0xa0] sm:$0xff]  ;;  %2118 = vmatpush1.bf16.msra.mxu0 %v2974_v26 }
  0x31   :  { %v2977_v35 = vpack.c.bf16 %v392_v31, %v388_v30  ;;  %v84_v36 = vld [vmem:[#allocation3 + $0xc8] sm:$0xff]  ;;  %v83_v38 = vld [vmem:[#allocation3 + $0xc0] sm:$0xff]  ;;  %2056 = vmatprep.subr.bf16.mxu1 %v2055_v27  ;;  %v2980_v39 = vpack.c.bf16 %v391_v33, %v387_v32 }
  0x32   :  { %v88_v37 = vld [vmem:[#allocation3 + $0xe8] sm:$0xff]  ;;  %v87_v41 = vld [vmem:[#allocation3 + $0xe0] sm:$0xff]  ;;  %2058 = vmatpush1.bf16.msra.mxu1 %v2057_v34 }
  0x33   :  { %v2059_v40 = vpack.c.bf16 %v88_v37, %v84_v36  ;;  %v396_v42 = vld [vmem:[#allocation5 + $0xc8] sm:$0xff]  ;;  %2120 = vmatprep.subr.bf16.mxu0 %v2977_v35  ;;  %v395_v45 = vld [vmem:[#allocation5 + $0xc0] sm:$0xff]  ;;  %v2061_v49 = vpack.c.bf16 %v87_v41, %v83_v38  ;;  %v62_v37 = vld [vmem:[#allocation3 + $0x18] sm:$0xff] }
  0x34   :  { %v400_v43 = vld [vmem:[#allocation5 + $0xe8] sm:$0xff]  ;;  %v399_v46 = vld [vmem:[#allocation5 + $0xe0] sm:$0xff]  ;;  %2122 = vmatpush1.bf16.msra.mxu0 %v2980_v39  ;;  %v66_v38 = vld [vmem:[#allocation3 + $0x38] sm:$0xff] }
  0x35   :  { %v2983_v44 = vpack.c.bf16 %v400_v43, %v396_v42  ;;  %v92_v47 = vld [vmem:[#allocation3 + $0x108] sm:$0xff]  ;;  %2060 = vmatprep.subr.bf16.mxu1 %v2059_v40  ;;  %v2986_v52 = vpack.c.bf16 %v399_v46, %v395_v45  ;;  %v91_v54 = vld [vmem:[#allocation3 + $0x100] sm:$0xff]  ;;  %v2079_v42 = vpack.c.bf16 %v66_v38, %v62_v37  ;;  %v61_v43 = vld [vmem:[#allocation3 + $0x10] sm:$0xff] }
  0x36   :  { %v96_v48 = vld [vmem:[#allocation3 + $0x128] sm:$0xff]  ;;  %v95_v55 = vld [vmem:[#allocation3 + $0x120] sm:$0xff]  ;;  %2062 = vmatpush1.bf16.msra.mxu1 %v2061_v49  ;;  %v65_v45 = vld [vmem:[#allocation3 + $0x30] sm:$0xff] }
  0x37   :  { %v404_v50 = vld [vmem:[#allocation5 + $0x108] sm:$0xff]  ;;  %v2063_v53 = vpack.c.bf16 %v96_v48, %v92_v47  ;;  %v403_v56 = vld [vmem:[#allocation5 + $0x100] sm:$0xff]  ;;  %2124 = vmatprep.subr.bf16.mxu0 %v2983_v44  ;;  %v2065_v63 = vpack.c.bf16 %v95_v55, %v91_v54  ;;  %v70_v46 = vld [vmem:[#allocation3 + $0x58] sm:$0xff]  ;;  %v2081_v49 = vpack.c.bf16 %v65_v45, %v61_v43 }
  0x38   :  { %v408_v51 = vld [vmem:[#allocation5 + $0x128] sm:$0xff]  ;;  %v407_v58 = vld [vmem:[#allocation5 + $0x120] sm:$0xff]  ;;  %2126 = vmatpush1.bf16.msra.mxu0 %v2986_v52  ;;  %v74_v47 = vld [vmem:[#allocation3 + $0x78] sm:$0xff] }
  0x39   :  { %v2989_v57 = vpack.c.bf16 %v408_v51, %v404_v50  ;;  %v100_v59 = vld [vmem:[#allocation3 + $0x148] sm:$0xff]  ;;  %2064 = vmatprep.subr.bf16.mxu1 %v2063_v53  ;;  %v2992_v1 = vpack.c.bf16 %v407_v58, %v403_v56  ;;  %v99_v3 = vld [vmem:[#allocation3 + $0x140] sm:$0xff]  ;;  %v2083_v50 = vpack.c.bf16 %v74_v47, %v70_v46  ;;  %v69_v51 = vld [vmem:[#allocation3 + $0x50] sm:$0xff] }
  0x3a   :  { %v104_v60 = vld [vmem:[#allocation3 + $0x168] sm:$0xff]  ;;  %v103_v4 = vld [vmem:[#allocation3 + $0x160] sm:$0xff]  ;;  %2066 = vmatpush1.bf16.msra.mxu1 %v2065_v63  ;;  %v73_v53 = vld [vmem:[#allocation3 + $0x70] sm:$0xff] }
  0x3b   :  { %v412_v61 = vld [vmem:[#allocation5 + $0x148] sm:$0xff]  ;;  %v2067_v2 = vpack.c.bf16 %v104_v60, %v100_v59  ;;  %v411_v5 = vld [vmem:[#allocation5 + $0x140] sm:$0xff]  ;;  %2128 = vmatprep.subr.bf16.mxu0 %v2989_v57  ;;  %v2069_v14 = vpack.c.bf16 %v103_v4, %v99_v3  ;;  %v78_v54 = vld [vmem:[#allocation3 + $0x98] sm:$0xff]  ;;  %v2085_v58 = vpack.c.bf16 %v73_v53, %v69_v51 }
  0x3c   :  { %v416_v62 = vld [vmem:[#allocation5 + $0x168] sm:$0xff]  ;;  %v415_v7 = vld [vmem:[#allocation5 + $0x160] sm:$0xff]  ;;  %2130 = vmatpush1.bf16.msra.mxu0 %v2992_v1  ;;  %v82_v55 = vld [vmem:[#allocation3 + $0xb8] sm:$0xff] }
  0x3d   :  { %v2995_v6 = vpack.c.bf16 %v416_v62, %v412_v61  ;;  %v108_v8 = vld [vmem:[#allocation3 + $0x188] sm:$0xff]  ;;  %2068 = vmatprep.subr.bf16.mxu1 %v2067_v2  ;;  %v2998_v15 = vpack.c.bf16 %v415_v7, %v411_v5  ;;  %v107_v17 = vld [vmem:[#allocation3 + $0x180] sm:$0xff]  ;;  %v2087_v59 = vpack.c.bf16 %v82_v55, %v78_v54  ;;  %v77_v60 = vld [vmem:[#allocation3 + $0x90] sm:$0xff] }
  0x3e   :  { %v112_v10 = vld [vmem:[#allocation3 + $0x1a8] sm:$0xff]  ;;  %v111_v18 = vld [vmem:[#allocation3 + $0x1a0] sm:$0xff]  ;;  %2070 = vmatpush1.bf16.msra.mxu1 %v2069_v14  ;;  %v81_v61 = vld [vmem:[#allocation3 + $0xb0] sm:$0xff] }
  0x3f   :  { %v420_v11 = vld [vmem:[#allocation5 + $0x188] sm:$0xff]  ;;  %v2071_v16 = vpack.c.bf16 %v112_v10, %v108_v8  ;;  %v419_v19 = vld [vmem:[#allocation5 + $0x180] sm:$0xff]  ;;  %2132 = vmatprep.subr.bf16.mxu0 %v2995_v6  ;;  %v2073_v28 = vpack.c.bf16 %v111_v18, %v107_v17  ;;  %v86_v62 = vld [vmem:[#allocation3 + $0xd8] sm:$0xff]  ;;  %v2089_v3 = vpack.c.bf16 %v81_v61, %v77_v60 }
  0x40   :  { %v424_v12 = vld [vmem:[#allocation5 + $0x1a8] sm:$0xff]  ;;  %v423_v21 = vld [vmem:[#allocation5 + $0x1a0] sm:$0xff]  ;;  %2134 = vmatpush1.bf16.msra.mxu0 %v2998_v15  ;;  %v90_v63 = vld [vmem:[#allocation3 + $0xf8] sm:$0xff] }
  0x41   :  { %v3001_v20 = vpack.c.bf16 %v424_v12, %v420_v11  ;;  %v116_v23 = vld [vmem:[#allocation3 + $0x1c8] sm:$0xff]  ;;  %2072 = vmatprep.subr.bf16.mxu1 %v2071_v16  ;;  %v3004_v29 = vpack.c.bf16 %v423_v21, %v419_v19  ;;  %v115_v31 = vld [vmem:[#allocation3 + $0x1c0] sm:$0xff]  ;;  %v3036_v2 = vld [vmem:[%s3580_s0 + $0x10] sm:$0xff]  ;;  %v2091_v4 = vpack.c.bf16 %v90_v63, %v86_v62 }
  0x42   :  { %v120_v24 = vld [vmem:[#allocation3 + $0x1e8] sm:$0xff]  ;;  %v119_v32 = vld [vmem:[#allocation3 + $0x1e0] sm:$0xff]  ;;  %2074 = vmatpush1.bf16.msra.mxu1 %v2073_v28  ;;  %v85_v5 = vld [vmem:[#allocation3 + $0xd0] sm:$0xff] }
  0x43   :  { %v428_v25 = vld [vmem:[#allocation5 + $0x1c8] sm:$0xff]  ;;  %v2075_v30 = vpack.c.bf16 %v120_v24, %v116_v23  ;;  %v427_v33 = vld [vmem:[#allocation5 + $0x1c0] sm:$0xff]  ;;  %2136 = vmatprep.subr.bf16.mxu0 %v3001_v20  ;;  %v2077_v40 = vpack.c.bf16 %v119_v32, %v115_v31  ;;  %v89_v7 = vld [vmem:[#allocation3 + $0xf0] sm:$0xff] }
  0x44   :  { %v432_v27 = vld [vmem:[#allocation5 + $0x1e8] sm:$0xff]  ;;  %v431_v36 = vld [vmem:[#allocation5 + $0x1e0] sm:$0xff]  ;;  %2138 = vmatpush1.bf16.msra.mxu0 %v3004_v29  ;;  %v94_v8 = vld [vmem:[#allocation3 + $0x118] sm:$0xff]  ;;  %v2093_v12 = vpack.c.bf16 %v89_v7, %v85_v5 }
  0x45   :  { %v3007_v34 = vpack.c.bf16 %v432_v27, %v428_v25  ;;  %2076 = vmatprep.subr.bf16.mxu1 %v2075_v30  ;;  %v3010_v41 = vpack.c.bf16 %v431_v36, %v427_v33  ;;  %v3016_v48 = vld [vmem:[%s3580_s0] sm:$0xff]  ;;  %v3025_v56 = vld [vmem:[%s3580_s0 + $0x8] sm:$0xff]  ;;  %v98_v10 = vld [vmem:[#allocation3 + $0x138] sm:$0xff] }
  0x46   :  { %2078 = vmatpush1.bf16.msra.mxu1 %v2077_v40  ;;  %v3045_v11 = vld [vmem:[%s3580_s0 + $0x18] sm:$0xff]  ;;  %v2095_v14 = vpack.c.bf16 %v98_v10, %v94_v8  ;;  %v93_v16 = vld [vmem:[#allocation3 + $0x110] sm:$0xff]  ;;  %v3054_v21 = vld [vmem:[%s3580_s0 + $0x20] sm:$0xff] }
  0x47   :  { %2140 = vmatprep.subr.bf16.mxu0 %v3007_v34  ;;  %2080 = vmatprep.subr.bf16.mxu1 %v2079_v42  ;;  %v97_v17 = vld [vmem:[#allocation3 + $0x130] sm:$0xff]  ;;  %v102_v18 = vld [vmem:[#allocation3 + $0x158] sm:$0xff]  ;;  %v3063_v31 = vld [vmem:[%s3580_s0 + $0x28] sm:$0xff] }
  0x48   :  { %2142 = vmatpush1.bf16.msra.mxu0 %v3010_v41  ;;  %v106_v19 = vld [vmem:[#allocation3 + $0x178] sm:$0xff]  ;;  %v2097_v23 = vpack.c.bf16 %v97_v17, %v93_v16  ;;  %v101_v25 = vld [vmem:[#allocation3 + $0x150] sm:$0xff] }
  0x49   :  { %2176 = vmatprep.subr.bf16.mxu0 %v2966_v9  ;;  %210 = vmatmul.mubr.f32.vlgmr.msra.gmra.mrb[0].mxu1 %v3016_v48  ;;  %v2099_v24 = vpack.c.bf16 %v106_v19, %v102_v18  ;;  %v105_v27 = vld [vmem:[#allocation3 + $0x170] sm:$0xff]  ;;  %v110_v28 = vld [vmem:[#allocation3 + $0x198] sm:$0xff] }
  0x4a   :  { %2082 = vmatpush1.bf16.msra.mxu1 %v2081_v49  ;;  %215 = vmatprep.mubr.f32.mxu1 %v3587_v0  ;;  %v114_v30 = vld [vmem:[#allocation3 + $0x1b8] sm:$0xff]  ;;  %v2101_v32 = vpack.c.bf16 %v105_v27, %v101_v25  ;;  %v109_v36 = vld [vmem:[#allocation3 + $0x190] sm:$0xff] }
  0x4b   :  { %500 = vmatmul.mubr.f32.vlgmr.msra.gmra.mrb[0].mxu0 %v3587_v0  ;;  %2084 = vmatprep.subr.bf16.mxu1 %v2083_v50  ;;  %v2103_v33 = vpack.c.bf16 %v114_v30, %v110_v28  ;;  %v113_v37 = vld [vmem:[#allocation3 + $0x1b0] sm:$0xff]  ;;  %v118_v38 = vld [vmem:[#allocation3 + $0x1d8] sm:$0xff] }
  0x4c   :  { %2178 = vmatpush1.bf16.msra.mxu0 %v2968_v13  ;;  %670 = vmatprep.mubr.f32.mxu0 %v3587_v0  ;;  %v122_v40 = vld [vmem:[#allocation3 + $0x1f8] sm:$0xff]  ;;  %v3072_v42 = vld [vmem:[%s3580_s0 + $0x30] sm:$0xff]  ;;  %v2105_v43 = vpack.c.bf16 %v113_v37, %v109_v36 }
  0x4d   :  { %216 = vmatmul.mubr.f32.gmra.mrb[2].mxu1 %v3025_v56  ;;  %2180 = vmatprep.subr.bf16.mxu0 %v2972_v22  ;;  %v2107_v45 = vpack.c.bf16 %v122_v40, %v118_v38  ;;  %v117_v46 = vld [vmem:[#allocation3 + $0x1d0] sm:$0xff]  ;;  %v374_v49 = vld [vmem:[#allocation5 + $0x18] sm:$0xff] }
  0x4e   :  { %2086 = vmatpush1.bf16.msra.mxu1 %v2085_v58  ;;  %221 = vmatprep.mubr.f32.mxu1 %v3587_v0  ;;  %v121_v47 = vld [vmem:[#allocation3 + $0x1f0] sm:$0xff]  ;;  %v378_v50 = vld [vmem:[#allocation5 + $0x38] sm:$0xff] }
  0x4f   :  { %2088 = vmatprep.subr.bf16.mxu1 %v2087_v59  ;;  %v3081_v51 = vld [vmem:[%s3580_s0 + $0x38] sm:$0xff]  ;;  %v2109_v53 = vpack.c.bf16 %v121_v47, %v117_v46  ;;  %v3083_v54 = vpack.c.bf16 %v378_v50, %v374_v49  ;;  %v373_v55 = vld [vmem:[#allocation5 + $0x10] sm:$0xff] }
  0x50   :  { %2182 = vmatpush1.bf16.msra.mxu0 %v2974_v26  ;;  %v377_v58 = vld [vmem:[#allocation5 + $0x30] sm:$0xff]  ;;  %v382_v59 = vld [vmem:[#allocation5 + $0x58] sm:$0xff] }
  0x51   :  { %222 = vmatmul.mubr.f32.gmra.mrb[4].mxu1 %v3036_v2  ;;  %2184 = vmatprep.subr.bf16.mxu0 %v2977_v35  ;;  %v386_v60 = vld [vmem:[#allocation5 + $0x78] sm:$0xff]  ;;  %v3089_v61 = vpack.c.bf16 %v377_v58, %v373_v55  ;;  %v381_v63 = vld [vmem:[#allocation5 + $0x50] sm:$0xff] }
  0x52   :  { %2090 = vmatpush1.bf16.msra.mxu1 %v2089_v3  ;;  %227 = vmatprep.mubr.f32.mxu1 %v3587_v0  ;;  %v3092_v62 = vpack.c.bf16 %v386_v60, %v382_v59  ;;  %v385_v3 = vld [vmem:[#allocation5 + $0x70] sm:$0xff]  ;;  %v394_v5 = vld [vmem:[#allocation5 + $0xb8] sm:$0xff]  ;;  %v123_v59 = vld [vmem:[%s3583_s3] sm:$0xf] }
  0x53   :  { %2092 = vmatprep.subr.bf16.mxu1 %v2091_v4  ;;  %v390_v4 = vld [vmem:[#allocation5 + $0x98] sm:$0xff]  ;;  %v3099_v7 = vpack.c.bf16 %v385_v3, %v381_v63  ;;  %v389_v10 = vld [vmem:[#allocation5 + $0x90] sm:$0xff] }
  0x54   :  { %2186 = vmatpush1.bf16.msra.mxu0 %v2980_v39  ;;  %v3102_v8 = vpack.c.bf16 %v394_v5, %v390_v4  ;;  %v402_v16 = vld [vmem:[#allocation5 + $0xf8] sm:$0xff]  ;;  %v397_v18 = vld [vmem:[#allocation5 + $0xd0] sm:$0xff] }
  0x55   :  { %228 = vmatmul.mubr.f32.gmra.mrb[6].mxu1 %v3045_v11  ;;  %2188 = vmatprep.subr.bf16.mxu0 %v2983_v44  ;;  %v401_v19 = vld [vmem:[#allocation5 + $0xf0] sm:$0xff]  ;;  %v414_v30 = vld [vmem:[#allocation5 + $0x158] sm:$0xff] }
  0x56   :  { %2094 = vmatpush1.bf16.msra.mxu1 %v2093_v12  ;;  %233 = vmatprep.mubr.f32.mxu1 %v3587_v0  ;;  %v393_v12 = vld [vmem:[#allocation5 + $0xb0] sm:$0xff]  ;;  %v422_v38 = vld [vmem:[#allocation5 + $0x198] sm:$0xff] }
  0x57   :  { %2096 = vmatprep.subr.bf16.mxu1 %v2095_v14  ;;  %v398_v14 = vld [vmem:[#allocation5 + $0xd8] sm:$0xff]  ;;  %v405_v27 = vld [vmem:[#allocation5 + $0x110] sm:$0xff] }
  0x58   :  { %2190 = vmatpush1.bf16.msra.mxu0 %v2986_v52  ;;  %v3110_v17 = vpack.c.bf16 %v402_v16, %v398_v14  ;;  %v409_v28 = vld [vmem:[#allocation5 + $0x130] sm:$0xff]  ;;  %v426_v40 = vld [vmem:[#allocation5 + $0x1b8] sm:$0xff] }
  0x59   :  { %234 = vmatmul.mubr.f32.gmra.mrb[8].mxu1 %v3054_v21  ;;  %2192 = vmatprep.subr.bf16.mxu0 %v2989_v57  ;;  %v413_v36 = vld [vmem:[#allocation5 + $0x150] sm:$0xff]  ;;  %v430_v47 = vld [vmem:[#allocation5 + $0x1d8] sm:$0xff] }
  0x5a   :  { %2098 = vmatpush1.bf16.msra.mxu1 %v2097_v23  ;;  %239 = vmatprep.mubr.f32.mxu1 %v3587_v0  ;;  %v406_v23 = vld [vmem:[#allocation5 + $0x118] sm:$0xff]  ;;  %v417_v37 = vld [vmem:[#allocation5 + $0x170] sm:$0xff] }
  0x5b   :  { %2100 = vmatprep.subr.bf16.mxu1 %v2099_v24  ;;  %v410_v24 = vld [vmem:[#allocation5 + $0x138] sm:$0xff]  ;;  %v425_v46 = vld [vmem:[#allocation5 + $0x1b0] sm:$0xff] }
  0x5c   :  { %2194 = vmatpush1.bf16.msra.mxu0 %v2992_v1  ;;  %v3118_v25 = vpack.c.bf16 %v410_v24, %v406_v23  ;;  %v434_v49 = vld [vmem:[#allocation5 + $0x1f8] sm:$0xff]  ;;  %v433_v55 = vld [vmem:[#allocation5 + $0x1f0] sm:$0xff] }
  0x5d   :  { %240 = vmatmul.mubr.f32.gmra.mrb[10].mxu1 %v3063_v31  ;;  %2196 = vmatprep.subr.bf16.mxu0 %v2995_v6  ;;  %v3142_v50 = vpack.c.bf16 %v434_v49, %v430_v47 }
  0x5e   :  { %2102 = vmatpush1.bf16.msra.mxu1 %v2101_v32  ;;  %245 = vmatprep.mubr.f32.mxu1 %v3587_v0  ;;  %v418_v32 = vld [vmem:[#allocation5 + $0x178] sm:$0xff] }
  0x5f   :  { %2104 = vmatprep.subr.bf16.mxu1 %v2103_v33  ;;  %v3126_v33 = vpack.c.bf16 %v418_v32, %v414_v30 }
  0x60   :  { %2198 = vmatpush1.bf16.msra.mxu0 %v2998_v15 }
  0x61   :  { %246 = vmatmul.mubr.f32.gmra.mrb[12].mxu1 %v3072_v42  ;;  %2200 = vmatprep.subr.bf16.mxu0 %v3001_v20 }
  0x62   :  { %2106 = vmatpush1.bf16.msra.mxu1 %v2105_v43  ;;  %251 = vmatprep.mubr.f32.mxu1 %v3587_v0  ;;  %v3134_v43 = vpack.c.bf16 %v426_v40, %v422_v38 }
  0x63   :  { %2108 = vmatprep.subr.bf16.mxu1 %v2107_v45  ;;  %v421_v45 = vld [vmem:[#allocation5 + $0x190] sm:$0xff] }
  0x64   :  { %2202 = vmatpush1.bf16.msra.mxu0 %v3004_v29 }
  0x65   :  { %252 = vmatmul.mubr.f32.gmra.mrb[14].mxu1 %v3081_v51  ;;  %2204 = vmatprep.subr.bf16.mxu0 %v3007_v34 }
  0x66   :  { %2110 = vmatpush1.bf16.msra.mxu1 %v2109_v53  ;;  %322 = vmatprep.mubr.f32.mxu1 %v3587_v0  ;;  %v429_v53 = vld [vmem:[#allocation5 + $0x1d0] sm:$0xff] }
  0x67   :  { %2144 = vmatprep.subr.bf16.mxu1 %v3083_v54  ;;  %v3147_v58 = vpack.c.bf16 %v433_v55, %v429_v53 }
  0x68   :  { %2206 = vmatpush1.bf16.msra.mxu0 %v3010_v41 }
  0x69   :  { %323 = vmatmul.mubr.f32.vlgmr.msra.gmra.mrb[16].mxu1 %v3016_v48  ;;  %2240 = vmatprep.subr.bf16.mxu0 %v2966_v9  ;;  %v3107_v48 = vpack.c.bf16 %v393_v12, %v389_v10 }
  0x6a   :  { %2146 = vmatpush1.bf16.msra.mxu1 %v3089_v61  ;;  %328 = vmatprep.mubr.f32.mxu1 %v3587_v0 }
  0x6b   :  { %2148 = vmatprep.subr.bf16.mxu1 %v3092_v62 }
  0x6d   :  { %329 = vmatmul.mubr.f32.gmra.mrb[18].mxu1 %v3025_v56  ;;  %v3115_v56 = vpack.c.bf16 %v401_v19, %v397_v18 }
  0x6e   :  { %2150 = vmatpush1.bf16.msra.mxu1 %v3099_v7  ;;  %334 = vmatprep.mubr.f32.mxu1 %v3587_v0 }
  0x6f   :  { %2152 = vmatprep.subr.bf16.mxu1 %v3102_v8 }
  0x71   :  { %335 = vmatmul.mubr.f32.gmra.mrb[20].mxu1 %v3036_v2  ;;  %v3123_v2 = vpack.c.bf16 %v409_v28, %v405_v27 }
  0x72   :  { %2154 = vmatpush1.bf16.msra.mxu1 %v3107_v48  ;;  %340 = vmatprep.mubr.f32.mxu1 %v3587_v0 }
  0x73   :  { %2156 = vmatprep.subr.bf16.mxu1 %v3110_v17 }
  0x75   :  { %341 = vmatmul.mubr.f32.gmra.mrb[22].mxu1 %v3045_v11  ;;  %v3131_v11 = vpack.c.bf16 %v417_v37, %v413_v36 }
  0x76   :  { %2158 = vmatpush1.bf16.msra.mxu1 %v3115_v56  ;;  %346 = vmatprep.mubr.f32.mxu1 %v3587_v0 }
  0x77   :  { %2160 = vmatprep.subr.bf16.mxu1 %v3118_v25 }
  0x79   :  { %347 = vmatmul.mubr.f32.gmra.mrb[24].mxu1 %v3054_v21  ;;  %v3139_v21 = vpack.c.bf16 %v425_v46, %v421_v45 }
  0x7a   :  { %2162 = vmatpush1.bf16.msra.mxu1 %v3123_v2  ;;  %352 = vmatprep.mubr.f32.mxu1 %v3587_v0 }
  0x7b   :  { %2164 = vmatprep.subr.bf16.mxu1 %v3126_v33 }
  0x7d   :  { %353 = vmatmul.mubr.f32.gmra.mrb[26].mxu1 %v3063_v31  ;;  %v125_v31 = vlaneseq }
  0x7e   :  { %2166 = vmatpush1.bf16.msra.mxu1 %v3131_v11  ;;  %358 = vmatprep.mubr.f32.mxu1 %v3587_v0 }
  0x7f   :  { %2168 = vmatprep.subr.bf16.mxu1 %v3134_v43 }
  0x81   :  { %359 = vmatmul.mubr.f32.gmra.mrb[28].mxu1 %v3072_v42  ;;  %v126_v42 = vshrl.u32 %v125_v31, 7 }
  0x82   :  { %2170 = vmatpush1.bf16.msra.mxu1 %v3139_v21  ;;  %364 = vmatprep.mubr.f32.mxu1 %v3587_v0 }
  0x83   :  { %2172 = vmatprep.subr.bf16.mxu1 %v3142_v50  ;;  %v131_v60 = vsub.s32 1, %v126_v42 }
  0x85   :  { %365 = vmatmul.mubr.f32.gmra.mrb[30].mxu1 %v3081_v51  ;;  %v127_v51 = vsub.s32 0, %v126_v42  ;;  %v132_v3 = vrot.slane %v123_v59, %v131_v60 }
  0x86   :  { %2174 = vmatpush1.bf16.msra.mxu1 %v3147_v58  ;;  %570 = vmatprep.mubr.f32.mxu1 %v3587_v0 }
  0x87   :  { %2208 = vmatprep.subr.bf16.mxu1 %v3083_v54  ;;  %v128_v63 = vrot.slane %v123_v59, %v127_v51 }
  0x89   :  { %571 = vmatmul.mubr.f32.vlgmr.msra.gmra.mrb[16].mxu1 %v3587_v0 }
  0x8a   :  { %2210 = vmatpush1.bf16.msra.mxu1 %v3089_v61  ;;  %741 = vmatprep.mubr.f32.mxu1 %v3587_v0 }
  0x8b   :  { %2212 = vmatprep.subr.bf16.mxu1 %v3092_v62 }
  0x8e   :  { %2214 = vmatpush1.bf16.msra.mxu1 %v3099_v7 }
  0x8f   :  { %2216 = vmatprep.subr.bf16.mxu1 %v3102_v8 }
  0x92   :  { %2218 = vmatpush1.bf16.msra.mxu1 %v3107_v48 }
  0x93   :  { %2220 = vmatprep.subr.bf16.mxu1 %v3110_v17 }
  0x96   :  { %2222 = vmatpush1.bf16.msra.mxu1 %v3115_v56 }
  0x97   :  { %2224 = vmatprep.subr.bf16.mxu1 %v3118_v25 }
  0x9a   :  { %2226 = vmatpush1.bf16.msra.mxu1 %v3123_v2 }
  0x9b   :  { %2228 = vmatprep.subr.bf16.mxu1 %v3126_v33 }
  0x9e   :  { %2230 = vmatpush1.bf16.msra.mxu1 %v3131_v11 }
  0x9f   :  { %2232 = vmatprep.subr.bf16.mxu1 %v3134_v43 }
  0xa2   :  { %2234 = vmatpush1.bf16.msra.mxu1 %v3139_v21 }
  0xa3   :  { %2236 = vmatprep.subr.bf16.mxu1 %v3142_v50 }
  0xa6   :  { %2238 = vmatpush1.bf16.msra.mxu1 %v3147_v58 }
  0xa7   :  { %2272 = vmatprep.subr.bf16.mxu1 %v3083_v54 }
 0x11c   :  { %v211_v4 = vpop.f32.mrb[0].mxu1 }
 0x11d   :  { %v212_v5 = vadd.f32 %v211_v4, %v128_v63  ;;  %v213_v10 = vpop.f32.mrb[1].mxu1 }
 0x11e   :  { %v501_v12 = vpop.f32.mrb[0].mxu0  ;;  %v214_v14 = vadd.f32 %v213_v10, %v132_v3 }
 0x11f   :  { %v503_v16 = vpop.f32.mrb[1].mxu0  ;;  %v577_v18 = vadd.f32 %v501_v12, %v212_v5 }
 0x120   :  { %v578_v19 = vadd.f32 %v503_v16, %v214_v14  ;;  %v217_v23 = vpop.f32.mrb[2].mxu1 }
 0x121   :  { %v3175_v24 = vadd.f32 %v217_v23, %v128_v63  ;;  %v219_v27 = vpop.f32.mrb[3].mxu1 }
 0x122   :  { %v3177_v28 = vadd.f32 %v219_v27, %v132_v3 }
 0x124   :  { %v223_v30 = vpop.f32.mrb[4].mxu1 }
 0x125   :  { %v3179_v32 = vadd.f32 %v223_v30, %v128_v63  ;;  %v225_v36 = vpop.f32.mrb[5].mxu1 }
 0x126   :  { %v3181_v37 = vadd.f32 %v225_v36, %v132_v3  ;;  %v1955_v36 = vmul.f32 -1.442695, %v578_v19 }
 0x128   :  { %v229_v38 = vpop.f32.mrb[6].mxu1  ;;  %2724 = vpow2.f32 %v1955_v36 }
 0x129   :  { %v3183_v40 = vadd.f32 %v229_v38, %v128_v63  ;;  %v231_v45 = vpop.f32.mrb[7].mxu1  ;;  %v1954_v38 = vmul.f32 -1.442695, %v577_v18 }
 0x12a   :  { %v3185_v46 = vadd.f32 %v231_v45, %v132_v3  ;;  %v135_v45 = vsub.s32 2, %v126_v42 }
 0x12b   :  { %2726 = vpow2.f32 %v1954_v38 }
 0x12c   :  { %v235_v47 = vpop.f32.mrb[8].mxu1 }
 0x12d   :  { %v3187_v49 = vadd.f32 %v235_v47, %v128_v63  ;;  %v237_v53 = vpop.f32.mrb[9].mxu1 }
 0x12e   :  { %v3189_v55 = vadd.f32 %v237_v53, %v132_v3  ;;  %v139_v53 = vsub.s32 3, %v126_v42 }
 0x130   :  { %v241_v31 = vpop.f32.mrb[10].mxu1 }
 0x131   :  { %v3191_v51 = vadd.f32 %v241_v31, %v128_v63  ;;  %v243_v60 = vpop.f32.mrb[11].mxu1 }
 0x132   :  { %v3193_v4 = vadd.f32 %v243_v60, %v132_v3  ;;  %v2725_v47 = vpop.eup %2724 }
 0x133   :  { %v590_v60 = vadd.f32 1.0, %v2725_v47 }
 0x134   :  { %v247_v5 = vpop.f32.mrb[12].mxu1 }
 0x135   :  { %v3195_v10 = vadd.f32 %v247_v5, %v128_v63  ;;  %v249_v12 = vpop.f32.mrb[13].mxu1  ;;  %v2727_v31 = vpop.eup %2726  ;;  %v3203_v5 = vrot.slane %v123_v59, %v135_v45  ;;  %2728 = vrcp.f32 %v590_v60 }
 0x136   :  { %v3197_v14 = vadd.f32 %v249_v12, %v132_v3  ;;  %v584_v0 = vadd.f32 1.0, %v2727_v31  ;;  %v3205_v12 = vrot.slane %v123_v59, %v139_v53  ;;  %v3591_v31 = vmov 0.0  }
 0x138   :  { %3589 = vst [vmem:[#allocation9_spill] sm:$0xff] %v3197_v14  ;;  %v253_v16 = vpop.f32.mrb[14].mxu1  ;;  %2730 = vrcp.f32 %v584_v0 }
 0x139   :  { %v3199_v23 = vadd.f32 %v253_v16, %v128_v63  ;;  %v255_v27 = vpop.f32.mrb[15].mxu1 }
 0x13a   :  { %v3201_v30 = vadd.f32 %v255_v27, %v132_v3 }
 0x13c   :  { %3590 = vst [vmem:[#allocation10_spill] sm:$0xff] %v3201_v30 }
 0x13f   :  { %v2729_v16 = vpop.eup %2728 }
 0x140   :  { %v600_v36 = vmul.f32 0.0, %v2729_v16 }
 0x142   :  { %v2731_v42 = vpop.eup %2730 }
 0x15c   :  { %v572_v14 = vpop.f32.mrb[16].mxu1 }
 0x15d   :  { %v2687_v63 = vadd.f32 %v572_v14, %v3203_v5  ;;  %v574_v3 = vpop.f32.mrb[17].mxu1 }
 0x15e   :  { %v2688_v18 = vadd.f32 %v574_v3, %v3205_v12 }
 0x15f   :  { %2732 = vtanh.f32 %v2687_v63 }
 0x160   :  { %v1956_v19 = vmul.f32 -1.442695, %v2688_v18 }
 0x162   :  { %2734 = vpow2.f32 %v1956_v19 }
 0x169   :  { %v2733_v27 = vpop.eup %2732 }
 0x16a   :  { %v601_v38 = vmul.f32 %v2733_v27, %v2731_v42 }
 0x16c   :  { %v2735_v45 = vpop.eup %2734  ;;  %v3209_v47 = vadd.f32 %v601_v38, %v600_v36 }
 0x16d   :  { %v597_v59 = vadd.f32 1.0, %v2735_v45 }
 0x16e   :  { %2736 = vtanh.f32 %v3209_v47 }
 0x16f   :  { %2738 = vrcp.f32 %v597_v59 }
 0x178   :  { %v2737_v14 = vpop.eup %2736 }
 0x179   :  { %v2739_v53 = vpop.eup %2738 }
 0x17a   :  { %v3212_v0 = vmul.f32 %v2739_v53, %v2737_v14 }
 0x17c   :  { %671 = vmatmul.mubr.f32.vlgmr.msra.gmra.mrb[2].mxu0 %v3212_v0  ;;  %742 = vmatmul.mubr.f32.vlgmr.msra.gmra.mrb[18].mxu1 %v3212_v0 }
 0x17d   :  { %2242 = vmatpush1.bf16.msra.mxu0 %v2968_v13  ;;  %2274 = vmatpush1.bf16.msra.mxu1 %v3089_v61 }
 0x17e   :  { %2244 = vmatprep.subr.bf16.mxu0 %v2972_v22  ;;  %2276 = vmatprep.subr.bf16.mxu1 %v3092_v62 }
 0x17f   :  { %841 = vmatprep.mubr.f32.mxu0 %v3591_v31  ;;  %912 = vmatprep.mubr.f32.mxu1 %v3591_v31 }
 0x181   :  { %2246 = vmatpush1.bf16.msra.mxu0 %v2974_v26  ;;  %2278 = vmatpush1.bf16.msra.mxu1 %v3099_v7 }
 0x182   :  { %2248 = vmatprep.subr.bf16.mxu0 %v2977_v35  ;;  %2280 = vmatprep.subr.bf16.mxu1 %v3102_v8 }
 0x185   :  { %2250 = vmatpush1.bf16.msra.mxu0 %v2980_v39  ;;  %2282 = vmatpush1.bf16.msra.mxu1 %v3107_v48 }
 0x186   :  { %2252 = vmatprep.subr.bf16.mxu0 %v2983_v44  ;;  %2284 = vmatprep.subr.bf16.mxu1 %v3110_v17 }
 0x189   :  { %2254 = vmatpush1.bf16.msra.mxu0 %v2986_v52  ;;  %2286 = vmatpush1.bf16.msra.mxu1 %v3115_v56 }
 0x18a   :  { %2256 = vmatprep.subr.bf16.mxu0 %v2989_v57  ;;  %2288 = vmatprep.subr.bf16.mxu1 %v3118_v25 }
 0x18d   :  { %2258 = vmatpush1.bf16.msra.mxu0 %v2992_v1  ;;  %2290 = vmatpush1.bf16.msra.mxu1 %v3123_v2 }
 0x18e   :  { %2260 = vmatprep.subr.bf16.mxu0 %v2995_v6  ;;  %2292 = vmatprep.subr.bf16.mxu1 %v3126_v33 }
 0x191   :  { %2262 = vmatpush1.bf16.msra.mxu0 %v2998_v15  ;;  %2294 = vmatpush1.bf16.msra.mxu1 %v3131_v11 }
 0x192   :  { %2264 = vmatprep.subr.bf16.mxu0 %v3001_v20  ;;  %2296 = vmatprep.subr.bf16.mxu1 %v3134_v43 }
 0x195   :  { %2266 = vmatpush1.bf16.msra.mxu0 %v3004_v29  ;;  %2298 = vmatpush1.bf16.msra.mxu1 %v3139_v21 }
 0x196   :  { %2268 = vmatprep.subr.bf16.mxu0 %v3007_v34  ;;  %2300 = vmatprep.subr.bf16.mxu1 %v3142_v50 }
 0x199   :  { %2270 = vmatpush1.bf16.msra.mxu0 %v3010_v41  ;;  %2302 = vmatpush1.bf16.msra.mxu1 %v3147_v58 }
 0x19a   :  { %2304 = vmatprep.subr.bf16.mxu0 %v2966_v9  ;;  %2336 = vmatprep.subr.bf16.mxu1 %v3083_v54 }
 0x24f   :  { %v672_v60 = vpop.f32.mrb[2].mxu0  ;;  %v743_v63 = vpop.f32.mrb[18].mxu1 }
 0x250   :  { %v748_v3 = vadd.f32 %v672_v60, %v3175_v24  ;;  %v674_v18 = vpop.f32.mrb[3].mxu0  ;;  %v745_v19 = vpop.f32.mrb[19].mxu1  ;;  %v2689_v45 = vadd.f32 %v743_v63, %v3203_v5 }
 0x251   :  { %v749_v16 = vadd.f32 %v674_v18, %v3177_v28  ;;  %v2690_v36 = vadd.f32 %v745_v19, %v3205_v12 }
 0x252   :  { %v1957_v42 = vmul.f32 -1.442695, %v748_v3 }
 0x253   :  { %v1958_v27 = vmul.f32 -1.442695, %v749_v16  ;;  %v1959_v38 = vmul.f32 -1.442695, %v2690_v36 }
 0x254   :  { %2740 = vpow2.f32 %v1957_v42 }
 0x255   :  { %2742 = vpow2.f32 %v1958_v27 }
 0x256   :  { %2744 = vpow2.f32 %v1959_v38 }
 0x257   :  { %2746 = vtanh.f32 %v2689_v45 }
 0x25e   :  { %v2741_v59 = vpop.eup %2740 }
 0x25f   :  { %v2743_v14 = vpop.eup %2742  ;;  %v755_v53 = vadd.f32 1.0, %v2741_v59 }
 0x260   :  { %v761_v30 = vadd.f32 1.0, %v2743_v14  ;;  %v2745_v24 = vpop.eup %2744 }
 0x261   :  { %2748 = vrcp.f32 %v755_v53  ;;  %v2747_v60 = vpop.eup %2746  ;;  %v768_v16 = vadd.f32 1.0, %v2745_v24 }
 0x262   :  { %2750 = vrcp.f32 %v761_v30 }
 0x263   :  { %2752 = vrcp.f32 %v768_v16 }
 0x26b   :  { %v2749_v28 = vpop.eup %2748 }
 0x26c   :  { %v2751_v3 = vpop.eup %2750  ;;  %v772_v18 = vmul.f32 %v2749_v28, %v2747_v60 }
 0x26d   :  { %v771_v42 = vmul.f32 %v2751_v3, %v3209_v47  ;;  %v2753_v63 = vpop.eup %2752 }
 0x26f   :  { %v3255_v19 = vadd.f32 %v772_v18, %v771_v42 }
 0x271   :  { %2754 = vtanh.f32 %v3255_v19 }
 0x27b   :  { %v2755_v27 = vpop.eup %2754 }
 0x27c   :  { %v3258_v36 = vmul.f32 %v2755_v27, %v2753_v63 }
 0x27e   :  { %842 = vmatmul.mubr.f32.vlgmr.msra.gmra.mrb[4].mxu0 %v3258_v36  ;;  %913 = vmatmul.mubr.f32.vlgmr.msra.gmra.mrb[20].mxu1 %v3258_v36 }
 0x27f   :  { %2306 = vmatpush1.bf16.msra.mxu0 %v2968_v13  ;;  %2338 = vmatpush1.bf16.msra.mxu1 %v3089_v61 }
 0x280   :  { %2308 = vmatprep.subr.bf16.mxu0 %v2972_v22  ;;  %2340 = vmatprep.subr.bf16.mxu1 %v3092_v62 }
 0x281   :  { %1012 = vmatprep.mubr.f32.mxu0 %v3591_v31  ;;  %1083 = vmatprep.mubr.f32.mxu1 %v3591_v31 }
 0x283   :  { %2310 = vmatpush1.bf16.msra.mxu0 %v2974_v26  ;;  %2342 = vmatpush1.bf16.msra.mxu1 %v3099_v7 }
 0x284   :  { %2312 = vmatprep.subr.bf16.mxu0 %v2977_v35  ;;  %2344 = vmatprep.subr.bf16.mxu1 %v3102_v8 }
 0x287   :  { %2314 = vmatpush1.bf16.msra.mxu0 %v2980_v39  ;;  %2346 = vmatpush1.bf16.msra.mxu1 %v3107_v48 }
 0x288   :  { %2316 = vmatprep.subr.bf16.mxu0 %v2983_v44  ;;  %2348 = vmatprep.subr.bf16.mxu1 %v3110_v17 }
 0x28b   :  { %2318 = vmatpush1.bf16.msra.mxu0 %v2986_v52  ;;  %2350 = vmatpush1.bf16.msra.mxu1 %v3115_v56 }
 0x28c   :  { %2320 = vmatprep.subr.bf16.mxu0 %v2989_v57  ;;  %2352 = vmatprep.subr.bf16.mxu1 %v3118_v25 }
 0x28f   :  { %2322 = vmatpush1.bf16.msra.mxu0 %v2992_v1  ;;  %2354 = vmatpush1.bf16.msra.mxu1 %v3123_v2 }
 0x290   :  { %2324 = vmatprep.subr.bf16.mxu0 %v2995_v6  ;;  %2356 = vmatprep.subr.bf16.mxu1 %v3126_v33 }
 0x293   :  { %2326 = vmatpush1.bf16.msra.mxu0 %v2998_v15  ;;  %2358 = vmatpush1.bf16.msra.mxu1 %v3131_v11 }
 0x294   :  { %2328 = vmatprep.subr.bf16.mxu0 %v3001_v20  ;;  %2360 = vmatprep.subr.bf16.mxu1 %v3134_v43 }
 0x297   :  { %2330 = vmatpush1.bf16.msra.mxu0 %v3004_v29  ;;  %2362 = vmatpush1.bf16.msra.mxu1 %v3139_v21 }
 0x298   :  { %2332 = vmatprep.subr.bf16.mxu0 %v3007_v34  ;;  %2364 = vmatprep.subr.bf16.mxu1 %v3142_v50 }
 0x29b   :  { %2334 = vmatpush1.bf16.msra.mxu0 %v3010_v41  ;;  %2366 = vmatpush1.bf16.msra.mxu1 %v3147_v58 }
 0x29c   :  { %2368 = vmatprep.subr.bf16.mxu0 %v2966_v9  ;;  %2400 = vmatprep.subr.bf16.mxu1 %v3083_v54 }
 0x351   :  { %v843_v30 = vpop.f32.mrb[4].mxu0  ;;  %v914_v47 = vpop.f32.mrb[20].mxu1 }
 0x352   :  { %v919_v38 = vadd.f32 %v843_v30, %v3179_v32  ;;  %v845_v45 = vpop.f32.mrb[5].mxu0  ;;  %v916_v59 = vpop.f32.mrb[21].mxu1  ;;  %v2691_v3 = vadd.f32 %v914_v47, %v3203_v5 }
 0x353   :  { %v920_v14 = vadd.f32 %v845_v45, %v3181_v37  ;;  %v2692_v60 = vadd.f32 %v916_v59, %v3205_v12 }
 0x354   :  { %v1960_v53 = vmul.f32 -1.442695, %v919_v38 }
 0x355   :  { %v1961_v24 = vmul.f32 -1.442695, %v920_v14  ;;  %v1962_v28 = vmul.f32 -1.442695, %v2692_v60 }
 0x356   :  { %2756 = vpow2.f32 %v1960_v53 }
 0x357   :  { %2758 = vpow2.f32 %v1961_v24 }
 0x358   :  { %2760 = vpow2.f32 %v1962_v28 }
 0x359   :  { %2762 = vtanh.f32 %v2691_v3 }
 0x360   :  { %v2757_v18 = vpop.eup %2756 }
 0x361   :  { %v2759_v16 = vpop.eup %2758  ;;  %v926_v42 = vadd.f32 1.0, %v2757_v18 }
 0x362   :  { %v932_v63 = vadd.f32 1.0, %v2759_v16  ;;  %v2761_v32 = vpop.eup %2760 }
 0x363   :  { %2764 = vrcp.f32 %v926_v42  ;;  %v2763_v27 = vpop.eup %2762  ;;  %v939_v45 = vadd.f32 1.0, %v2761_v32 }
 0x364   :  { %2766 = vrcp.f32 %v932_v63 }
 0x365   :  { %2768 = vrcp.f32 %v939_v45 }
 0x36d   :  { %v2765_v37 = vpop.eup %2764 }
 0x36e   :  { %v2767_v30 = vpop.eup %2766  ;;  %v943_v38 = vmul.f32 %v2765_v37, %v2763_v27 }
 0x36f   :  { %v942_v14 = vmul.f32 %v2767_v30, %v3255_v19  ;;  %v2769_v47 = vpop.eup %2768 }
 0x371   :  { %v3301_v59 = vadd.f32 %v943_v38, %v942_v14 }
 0x373   :  { %2770 = vtanh.f32 %v3301_v59 }
 0x37d   :  { %v2771_v53 = vpop.eup %2770 }
 0x37e   :  { %v3304_v24 = vmul.f32 %v2771_v53, %v2769_v47 }
 0x380   :  { %1013 = vmatmul.mubr.f32.vlgmr.msra.gmra.mrb[6].mxu0 %v3304_v24  ;;  %1084 = vmatmul.mubr.f32.vlgmr.msra.gmra.mrb[22].mxu1 %v3304_v24 }
 0x381   :  { %2370 = vmatpush1.bf16.msra.mxu0 %v2968_v13  ;;  %2402 = vmatpush1.bf16.msra.mxu1 %v3089_v61 }
 0x382   :  { %2372 = vmatprep.subr.bf16.mxu0 %v2972_v22  ;;  %2404 = vmatprep.subr.bf16.mxu1 %v3092_v62 }
 0x383   :  { %1183 = vmatprep.mubr.f32.mxu0 %v3591_v31  ;;  %1254 = vmatprep.mubr.f32.mxu1 %v3591_v31 }
 0x385   :  { %2374 = vmatpush1.bf16.msra.mxu0 %v2974_v26  ;;  %2406 = vmatpush1.bf16.msra.mxu1 %v3099_v7 }
 0x386   :  { %2376 = vmatprep.subr.bf16.mxu0 %v2977_v35  ;;  %2408 = vmatprep.subr.bf16.mxu1 %v3102_v8 }
 0x389   :  { %2378 = vmatpush1.bf16.msra.mxu0 %v2980_v39  ;;  %2410 = vmatpush1.bf16.msra.mxu1 %v3107_v48 }
 0x38a   :  { %2380 = vmatprep.subr.bf16.mxu0 %v2983_v44  ;;  %2412 = vmatprep.subr.bf16.mxu1 %v3110_v17 }
 0x38d   :  { %2382 = vmatpush1.bf16.msra.mxu0 %v2986_v52  ;;  %2414 = vmatpush1.bf16.msra.mxu1 %v3115_v56 }
 0x38e   :  { %2384 = vmatprep.subr.bf16.mxu0 %v2989_v57  ;;  %2416 = vmatprep.subr.bf16.mxu1 %v3118_v25 }
 0x391   :  { %2386 = vmatpush1.bf16.msra.mxu0 %v2992_v1  ;;  %2418 = vmatpush1.bf16.msra.mxu1 %v3123_v2 }
 0x392   :  { %2388 = vmatprep.subr.bf16.mxu0 %v2995_v6  ;;  %2420 = vmatprep.subr.bf16.mxu1 %v3126_v33 }
 0x395   :  { %2390 = vmatpush1.bf16.msra.mxu0 %v2998_v15  ;;  %2422 = vmatpush1.bf16.msra.mxu1 %v3131_v11 }
 0x396   :  { %2392 = vmatprep.subr.bf16.mxu0 %v3001_v20  ;;  %2424 = vmatprep.subr.bf16.mxu1 %v3134_v43 }
 0x399   :  { %2394 = vmatpush1.bf16.msra.mxu0 %v3004_v29  ;;  %2426 = vmatpush1.bf16.msra.mxu1 %v3139_v21 }
 0x39a   :  { %2396 = vmatprep.subr.bf16.mxu0 %v3007_v34  ;;  %2428 = vmatprep.subr.bf16.mxu1 %v3142_v50 }
 0x39d   :  { %2398 = vmatpush1.bf16.msra.mxu0 %v3010_v41  ;;  %2430 = vmatpush1.bf16.msra.mxu1 %v3147_v58 }
 0x39e   :  { %2432 = vmatprep.subr.bf16.mxu0 %v2966_v9  ;;  %2464 = vmatprep.subr.bf16.mxu1 %v3083_v54 }
 0x453   :  { %v1014_v19 = vpop.f32.mrb[6].mxu0  ;;  %v1085_v60 = vpop.f32.mrb[22].mxu1 }
 0x454   :  { %v1090_v28 = vadd.f32 %v1014_v19, %v3183_v40  ;;  %v1016_v3 = vpop.f32.mrb[7].mxu0  ;;  %v1087_v18 = vpop.f32.mrb[23].mxu1  ;;  %v2693_v37 = vadd.f32 %v1085_v60, %v3203_v5 }
 0x455   :  { %v1091_v16 = vadd.f32 %v1016_v3, %v3185_v46  ;;  %v2694_v32 = vadd.f32 %v1087_v18, %v3205_v12 }
 0x456   :  { %v1963_v42 = vmul.f32 -1.442695, %v1090_v28 }
 0x457   :  { %v1964_v63 = vmul.f32 -1.442695, %v1091_v16  ;;  %v1965_v27 = vmul.f32 -1.442695, %v2694_v32 }
 0x458   :  { %2772 = vpow2.f32 %v1963_v42 }
 0x459   :  { %2774 = vpow2.f32 %v1964_v63 }
 0x45a   :  { %2776 = vpow2.f32 %v1965_v27 }
 0x45b   :  { %2778 = vtanh.f32 %v2693_v37 }
 0x462   :  { %v2773_v30 = vpop.eup %2772 }
 0x463   :  { %v2775_v38 = vpop.eup %2774  ;;  %v1097_v45 = vadd.f32 1.0, %v2773_v30 }
 0x464   :  { %v1103_v14 = vadd.f32 1.0, %v2775_v38  ;;  %v2777_v40 = vpop.eup %2776 }
 0x465   :  { %2780 = vrcp.f32 %v1097_v45  ;;  %v2779_v47 = vpop.eup %2778  ;;  %v1110_v28 = vadd.f32 1.0, %v2777_v40 }
 0x466   :  { %2782 = vrcp.f32 %v1103_v14 }
 0x467   :  { %2784 = vrcp.f32 %v1110_v28 }
 0x46f   :  { %v2781_v46 = vpop.eup %2780 }
 0x470   :  { %v2783_v53 = vpop.eup %2782  ;;  %v1114_v19 = vmul.f32 %v2781_v46, %v2779_v47 }
 0x471   :  { %v1113_v3 = vmul.f32 %v2783_v53, %v3301_v59  ;;  %v2785_v60 = vpop.eup %2784 }
 0x473   :  { %v3347_v18 = vadd.f32 %v1114_v19, %v1113_v3 }
 0x475   :  { %2786 = vtanh.f32 %v3347_v18 }
 0x47f   :  { %v2787_v16 = vpop.eup %2786 }
 0x480   :  { %v3350_v42 = vmul.f32 %v2787_v16, %v2785_v60 }
 0x482   :  { %1184 = vmatmul.mubr.f32.vlgmr.msra.gmra.mrb[8].mxu0 %v3350_v42  ;;  %1255 = vmatmul.mubr.f32.vlgmr.msra.gmra.mrb[24].mxu1 %v3350_v42 }
 0x483   :  { %2434 = vmatpush1.bf16.msra.mxu0 %v2968_v13  ;;  %2466 = vmatpush1.bf16.msra.mxu1 %v3089_v61 }
 0x484   :  { %2436 = vmatprep.subr.bf16.mxu0 %v2972_v22  ;;  %2468 = vmatprep.subr.bf16.mxu1 %v3092_v62 }
 0x485   :  { %1354 = vmatprep.mubr.f32.mxu0 %v3591_v31  ;;  %1425 = vmatprep.mubr.f32.mxu1 %v3591_v31 }
 0x487   :  { %2438 = vmatpush1.bf16.msra.mxu0 %v2974_v26  ;;  %2470 = vmatpush1.bf16.msra.mxu1 %v3099_v7 }
 0x488   :  { %2440 = vmatprep.subr.bf16.mxu0 %v2977_v35  ;;  %2472 = vmatprep.subr.bf16.mxu1 %v3102_v8 }
 0x48b   :  { %2442 = vmatpush1.bf16.msra.mxu0 %v2980_v39  ;;  %2474 = vmatpush1.bf16.msra.mxu1 %v3107_v48 }
 0x48c   :  { %2444 = vmatprep.subr.bf16.mxu0 %v2983_v44  ;;  %2476 = vmatprep.subr.bf16.mxu1 %v3110_v17 }
 0x48f   :  { %2446 = vmatpush1.bf16.msra.mxu0 %v2986_v52  ;;  %2478 = vmatpush1.bf16.msra.mxu1 %v3115_v56 }
 0x490   :  { %2448 = vmatprep.subr.bf16.mxu0 %v2989_v57  ;;  %2480 = vmatprep.subr.bf16.mxu1 %v3118_v25 }
 0x493   :  { %2450 = vmatpush1.bf16.msra.mxu0 %v2992_v1  ;;  %2482 = vmatpush1.bf16.msra.mxu1 %v3123_v2 }
 0x494   :  { %2452 = vmatprep.subr.bf16.mxu0 %v2995_v6  ;;  %2484 = vmatprep.subr.bf16.mxu1 %v3126_v33 }
 0x497   :  { %2454 = vmatpush1.bf16.msra.mxu0 %v2998_v15  ;;  %2486 = vmatpush1.bf16.msra.mxu1 %v3131_v11 }
 0x498   :  { %2456 = vmatprep.subr.bf16.mxu0 %v3001_v20  ;;  %2488 = vmatprep.subr.bf16.mxu1 %v3134_v43 }
 0x49b   :  { %2458 = vmatpush1.bf16.msra.mxu0 %v3004_v29  ;;  %2490 = vmatpush1.bf16.msra.mxu1 %v3139_v21 }
 0x49c   :  { %2460 = vmatprep.subr.bf16.mxu0 %v3007_v34  ;;  %2492 = vmatprep.subr.bf16.mxu1 %v3142_v50 }
 0x49f   :  { %2462 = vmatpush1.bf16.msra.mxu0 %v3010_v41  ;;  %2494 = vmatpush1.bf16.msra.mxu1 %v3147_v58 }
 0x4a0   :  { %2496 = vmatprep.subr.bf16.mxu0 %v2966_v9  ;;  %2528 = vmatprep.subr.bf16.mxu1 %v3083_v54 }
 0x555   :  { %v1185_v59 = vpop.f32.mrb[8].mxu0  ;;  %v1256_v63 = vpop.f32.mrb[24].mxu1 }
 0x556   :  { %v1261_v32 = vadd.f32 %v1185_v59, %v3187_v49  ;;  %v1187_v27 = vpop.f32.mrb[9].mxu0  ;;  %v1258_v37 = vpop.f32.mrb[25].mxu1  ;;  %v2695_v47 = vadd.f32 %v1256_v63, %v3203_v5 }
 0x557   :  { %v1262_v30 = vadd.f32 %v1187_v27, %v3189_v55  ;;  %v2696_v14 = vadd.f32 %v1258_v37, %v3205_v12 }
 0x558   :  { %v1966_v38 = vmul.f32 -1.442695, %v1261_v32 }
 0x559   :  { %v1967_v45 = vmul.f32 -1.442695, %v1262_v30  ;;  %v1968_v40 = vmul.f32 -1.442695, %v2696_v14 }
 0x55a   :  { %2788 = vpow2.f32 %v1966_v38 }
 0x55b   :  { %2790 = vpow2.f32 %v1967_v45 }
 0x55c   :  { %2792 = vpow2.f32 %v1968_v40 }
 0x55d   :  { %2794 = vtanh.f32 %v2695_v47 }
 0x564   :  { %v2789_v46 = vpop.eup %2788 }
 0x565   :  { %v2791_v53 = vpop.eup %2790  ;;  %v1268_v19 = vadd.f32 1.0, %v2789_v46 }
 0x566   :  { %v1274_v28 = vadd.f32 1.0, %v2791_v53  ;;  %v2793_v49 = vpop.eup %2792 }
 0x567   :  { %2796 = vrcp.f32 %v1268_v19  ;;  %v2795_v3 = vpop.eup %2794  ;;  %v1281_v59 = vadd.f32 1.0, %v2793_v49 }
 0x568   :  { %2798 = vrcp.f32 %v1274_v28 }
 0x569   :  { %2800 = vrcp.f32 %v1281_v59 }
 0x571   :  { %v2797_v55 = vpop.eup %2796 }
 0x572   :  { %v2799_v60 = vpop.eup %2798  ;;  %v1285_v16 = vmul.f32 %v2797_v55, %v2795_v3 }
 0x573   :  { %v1284_v32 = vmul.f32 %v2799_v60, %v3347_v18  ;;  %v2801_v63 = vpop.eup %2800 }
 0x575   :  { %v3393_v27 = vadd.f32 %v1285_v16, %v1284_v32 }
 0x577   :  { %2802 = vtanh.f32 %v3393_v27 }
 0x581   :  { %v2803_v37 = vpop.eup %2802 }
 0x582   :  { %v3396_v30 = vmul.f32 %v2803_v37, %v2801_v63 }
 0x584   :  { %1355 = vmatmul.mubr.f32.vlgmr.msra.gmra.mrb[10].mxu0 %v3396_v30  ;;  %1426 = vmatmul.mubr.f32.vlgmr.msra.gmra.mrb[26].mxu1 %v3396_v30 }
 0x585   :  { %2498 = vmatpush1.bf16.msra.mxu0 %v2968_v13  ;;  %2530 = vmatpush1.bf16.msra.mxu1 %v3089_v61 }
 0x586   :  { %2500 = vmatprep.subr.bf16.mxu0 %v2972_v22  ;;  %2532 = vmatprep.subr.bf16.mxu1 %v3092_v62 }
 0x587   :  { %1525 = vmatprep.mubr.f32.mxu0 %v3591_v31  ;;  %1596 = vmatprep.mubr.f32.mxu1 %v3591_v31 }
 0x589   :  { %2502 = vmatpush1.bf16.msra.mxu0 %v2974_v26  ;;  %2534 = vmatpush1.bf16.msra.mxu1 %v3099_v7 }
 0x58a   :  { %2504 = vmatprep.subr.bf16.mxu0 %v2977_v35  ;;  %2536 = vmatprep.subr.bf16.mxu1 %v3102_v8 }
 0x58d   :  { %2506 = vmatpush1.bf16.msra.mxu0 %v2980_v39  ;;  %2538 = vmatpush1.bf16.msra.mxu1 %v3107_v48 }
 0x58e   :  { %2508 = vmatprep.subr.bf16.mxu0 %v2983_v44  ;;  %2540 = vmatprep.subr.bf16.mxu1 %v3110_v17 }
 0x591   :  { %2510 = vmatpush1.bf16.msra.mxu0 %v2986_v52  ;;  %2542 = vmatpush1.bf16.msra.mxu1 %v3115_v56 }
 0x592   :  { %2512 = vmatprep.subr.bf16.mxu0 %v2989_v57  ;;  %2544 = vmatprep.subr.bf16.mxu1 %v3118_v25 }
 0x595   :  { %2514 = vmatpush1.bf16.msra.mxu0 %v2992_v1  ;;  %2546 = vmatpush1.bf16.msra.mxu1 %v3123_v2 }
 0x596   :  { %2516 = vmatprep.subr.bf16.mxu0 %v2995_v6  ;;  %2548 = vmatprep.subr.bf16.mxu1 %v3126_v33 }
 0x599   :  { %2518 = vmatpush1.bf16.msra.mxu0 %v2998_v15  ;;  %2550 = vmatpush1.bf16.msra.mxu1 %v3131_v11 }
 0x59a   :  { %2520 = vmatprep.subr.bf16.mxu0 %v3001_v20  ;;  %2552 = vmatprep.subr.bf16.mxu1 %v3134_v43 }
 0x59d   :  { %2522 = vmatpush1.bf16.msra.mxu0 %v3004_v29  ;;  %2554 = vmatpush1.bf16.msra.mxu1 %v3139_v21 }
 0x59e   :  { %2524 = vmatprep.subr.bf16.mxu0 %v3007_v34  ;;  %2556 = vmatprep.subr.bf16.mxu1 %v3142_v50 }
 0x5a1   :  { %2526 = vmatpush1.bf16.msra.mxu0 %v3010_v41  ;;  %2558 = vmatpush1.bf16.msra.mxu1 %v3147_v58 }
 0x5a2   :  { %2560 = vmatprep.subr.bf16.mxu0 %v2966_v9  ;;  %2592 = vmatprep.subr.bf16.mxu1 %v3083_v54 }
 0x657   :  { %v1356_v18 = vpop.f32.mrb[10].mxu0  ;;  %v1427_v38 = vpop.f32.mrb[26].mxu1 }
 0x658   :  { %v1432_v45 = vadd.f32 %v1356_v18, %v3191_v51  ;;  %v1358_v14 = vpop.f32.mrb[11].mxu0  ;;  %v1429_v40 = vpop.f32.mrb[27].mxu1  ;;  %v2697_v49 = vadd.f32 %v1427_v38, %v3203_v5 }
 0x659   :  { %v1433_v47 = vadd.f32 %v1358_v14, %v3193_v4  ;;  %v2698_v19 = vadd.f32 %v1429_v40, %v3205_v12  ;;  %v1815_v14 = vld [vmem:[%s3584_s4 + $0x20] sm:$0xff]  ;;  %v1816_v40 = vld [vmem:[%s3584_s4 + $0x28] sm:$0xff] }
 0x65a   :  { %v1969_v46 = vmul.f32 -1.442695, %v1432_v45 }
 0x65b   :  { %v1970_v53 = vmul.f32 -1.442695, %v1433_v47  ;;  %v1971_v28 = vmul.f32 -1.442695, %v2698_v19  ;;  %v2631_v47 = vpack.c.bf16 %v1816_v40, %v1815_v14 }
 0x65c   :  { %2804 = vpow2.f32 %v1969_v46  ;;  %v1817_v46 = vld [vmem:[%s3584_s4 + $0x30] sm:$0xff] }
 0x65d   :  { %2806 = vpow2.f32 %v1970_v53  ;;  %v1818_v53 = vld [vmem:[%s3584_s4 + $0x38] sm:$0xff] }
 0x65e   :  { %2808 = vpow2.f32 %v1971_v28  ;;  %v2635_v19 = vpack.c.bf16 %v1818_v53, %v1817_v46  ;;  %v1819_v28 = vld [vmem:[%s3584_s4 + $0x40] sm:$0xff] }
 0x65f   :  { %2810 = vtanh.f32 %v2697_v49 }
 0x666   :  { %v2805_v9 = vpop.eup %2804 }
 0x667   :  { %v2807_v3 = vpop.eup %2806  ;;  %v1439_v54 = vadd.f32 1.0, %v2805_v9  ;;  %v1821_v9 = vld [vmem:[%s3584_s4 + $0x50] sm:$0xff] }
 0x668   :  { %v1445_v55 = vadd.f32 1.0, %v2807_v3  ;;  %v2809_v51 = vpop.eup %2808  ;;  %v1822_v3 = vld [vmem:[%s3584_s4 + $0x58] sm:$0xff] }
 0x669   :  { %2812 = vrcp.f32 %v1439_v54  ;;  %v2811_v60 = vpop.eup %2810  ;;  %v1452_v32 = vadd.f32 1.0, %v2809_v51  ;;  %v2643_v54 = vpack.c.bf16 %v1822_v3, %v1821_v9  ;;  %v1824_v51 = vld [vmem:[%s3584_s4 + $0x68] sm:$0xff] }
 0x66a   :  { %2814 = vrcp.f32 %v1445_v55  ;;  %v1823_v55 = vld [vmem:[%s3584_s4 + $0x60] sm:$0xff] }
 0x66b   :  { %2816 = vrcp.f32 %v1452_v32 }
 0x673   :  { %v2813_v4 = vpop.eup %2812 }
 0x674   :  { %v2815_v16 = vpop.eup %2814  ;;  %v1456_v59 = vmul.f32 %v2813_v4, %v2811_v60  ;;  %v2647_v60 = vpack.c.bf16 %v1824_v51, %v1823_v55  ;;  %v1825_v4 = vld [vmem:[%s3584_s4 + $0x70] sm:$0xff] }
 0x675   :  { %v1455_v63 = vmul.f32 %v2815_v16, %v3393_v27  ;;  %v2817_v18 = vpop.eup %2816  ;;  %v1826_v16 = vld [vmem:[%s3584_s4 + $0x78] sm:$0xff] }
 0x677   :  { %v3439_v37 = vadd.f32 %v1456_v59, %v1455_v63  ;;  %v2651_v59 = vpack.c.bf16 %v1826_v16, %v1825_v4 }
 0x679   :  { %2818 = vtanh.f32 %v3439_v37 }
 0x683   :  { %v2819_v38 = vpop.eup %2818 }
 0x684   :  { %v3442_v45 = vmul.f32 %v2819_v38, %v2817_v18 }
 0x686   :  { %1526 = vmatmul.mubr.f32.vlgmr.msra.gmra.mrb[12].mxu0 %v3442_v45  ;;  %1597 = vmatmul.mubr.f32.vlgmr.msra.gmra.mrb[28].mxu1 %v3442_v45 }
 0x687   :  { %2562 = vmatpush1.bf16.msra.mxu0 %v2968_v13  ;;  %2594 = vmatpush1.bf16.msra.mxu1 %v3089_v61  ;;  %v1811_v13 = vld [vmem:[%s3584_s4] sm:$0xff] }
 0x688   :  { %2564 = vmatprep.subr.bf16.mxu0 %v2972_v22  ;;  %2596 = vmatprep.subr.bf16.mxu1 %v3092_v62  ;;  %v1812_v22 = vld [vmem:[%s3584_s4 + $0x8] sm:$0xff] }
 0x689   :  { %1696 = vmatprep.mubr.f32.mxu0 %v3591_v31  ;;  %1767 = vmatprep.mubr.f32.mxu1 %v3591_v31 }
 0x68b   :  { %2566 = vmatpush1.bf16.msra.mxu0 %v2974_v26  ;;  %2598 = vmatpush1.bf16.msra.mxu1 %v3099_v7  ;;  %v2623_v26 = vpack.c.bf16 %v1812_v22, %v1811_v13  ;;  %v3593_v13 = vld [vmem:[#allocation10_spill] sm:$0xff] }
 0x68c   :  { %2568 = vmatprep.subr.bf16.mxu0 %v2977_v35  ;;  %2600 = vmatprep.subr.bf16.mxu1 %v3102_v8 }
 0x68f   :  { %2570 = vmatpush1.bf16.msra.mxu0 %v2980_v39  ;;  %2602 = vmatpush1.bf16.msra.mxu1 %v3107_v48 }
 0x690   :  { %2572 = vmatprep.subr.bf16.mxu0 %v2983_v44  ;;  %2604 = vmatprep.subr.bf16.mxu1 %v3110_v17 }
 0x693   :  { %2574 = vmatpush1.bf16.msra.mxu0 %v2986_v52  ;;  %2606 = vmatpush1.bf16.msra.mxu1 %v3115_v56 }
 0x694   :  { %2576 = vmatprep.subr.bf16.mxu0 %v2989_v57  ;;  %2608 = vmatprep.subr.bf16.mxu1 %v3118_v25 }
 0x697   :  { %2578 = vmatpush1.bf16.msra.mxu0 %v2992_v1  ;;  %2610 = vmatpush1.bf16.msra.mxu1 %v3123_v2  ;;  %v3592_v1 = vld [vmem:[#allocation9_spill] sm:$0xff] }
 0x698   :  { %2580 = vmatprep.subr.bf16.mxu0 %v2995_v6  ;;  %2612 = vmatprep.subr.bf16.mxu1 %v3126_v33 }
 0x69b   :  { %2582 = vmatpush1.bf16.msra.mxu0 %v2998_v15  ;;  %2614 = vmatpush1.bf16.msra.mxu1 %v3131_v11 }
 0x69c   :  { %2584 = vmatprep.subr.bf16.mxu0 %v3001_v20  ;;  %2616 = vmatprep.subr.bf16.mxu1 %v3134_v43 }
 0x69f   :  { %2586 = vmatpush1.bf16.msra.mxu0 %v3004_v29  ;;  %2618 = vmatpush1.bf16.msra.mxu1 %v3139_v21  ;;  %v1813_v21 = vld [vmem:[%s3584_s4 + $0x10] sm:$0xff] }
 0x6a0   :  { %2588 = vmatprep.subr.bf16.mxu0 %v3007_v34  ;;  %2620 = vmatprep.subr.bf16.mxu1 %v3142_v50  ;;  %v1814_v50 = vld [vmem:[%s3584_s4 + $0x18] sm:$0xff] }
 0x6a1   :  { %v2627_v27 = vpack.c.bf16 %v1814_v50, %v1813_v21 }
 0x6a3   :  { %2590 = vmatpush1.bf16.msra.mxu0 %v3010_v41  ;;  %2622 = vmatpush1.bf16.msra.mxu1 %v3147_v58 }
 0x6a4   :  { %2624 = vmatprep.subr.bf16.mxu0 %v2623_v26 }
 0x759   :  { %v1527_v35 = vpop.f32.mrb[12].mxu0  ;;  %v1598_v39 = vpop.f32.mrb[28].mxu1 }
 0x75a   :  { %v1603_v44 = vadd.f32 %v1527_v35, %v3195_v10  ;;  %v1529_v52 = vpop.f32.mrb[13].mxu0  ;;  %v1600_v57 = vpop.f32.mrb[29].mxu1  ;;  %v2699_v41 = vadd.f32 %v1598_v39, %v3203_v5 }
 0x75b   :  { %v1604_v6 = vadd.f32 %v1529_v52, %v3592_v1  ;;  %v2700_v29 = vadd.f32 %v1600_v57, %v3205_v12 }
 0x75c   :  { %v1972_v15 = vmul.f32 -1.442695, %v1603_v44 }
 0x75d   :  { %v1973_v20 = vmul.f32 -1.442695, %v1604_v6  ;;  %v1974_v34 = vmul.f32 -1.442695, %v2700_v29 }
 0x75e   :  { %2820 = vpow2.f32 %v1972_v15 }
 0x75f   :  { %2822 = vpow2.f32 %v1973_v20 }
 0x760   :  { %2824 = vpow2.f32 %v1974_v34 }
 0x761   :  { %2826 = vtanh.f32 %v2699_v41 }
 0x768   :  { %v2821_v61 = vpop.eup %2820 }
 0x769   :  { %v2823_v62 = vpop.eup %2822  ;;  %v1610_v7 = vadd.f32 1.0, %v2821_v61 }
 0x76a   :  { %v1616_v8 = vadd.f32 1.0, %v2823_v62  ;;  %v2825_v48 = vpop.eup %2824 }
 0x76b   :  { %2828 = vrcp.f32 %v1610_v7  ;;  %v2827_v17 = vpop.eup %2826  ;;  %v1623_v33 = vadd.f32 1.0, %v2825_v48 }
 0x76c   :  { %2830 = vrcp.f32 %v1616_v8 }
 0x76d   :  { %2832 = vrcp.f32 %v1623_v33 }
 0x775   :  { %v2829_v56 = vpop.eup %2828 }
 0x776   :  { %v2831_v25 = vpop.eup %2830  ;;  %v1627_v2 = vmul.f32 %v2829_v56, %v2827_v17 }
 0x777   :  { %v1626_v11 = vmul.f32 %v2831_v25, %v3439_v37  ;;  %v2833_v58 = vpop.eup %2832 }
 0x779   :  { %v3489_v43 = vadd.f32 %v1627_v2, %v1626_v11 }
 0x77b   :  { %2834 = vtanh.f32 %v3489_v43 }
 0x785   :  { %v2835_v10 = vpop.eup %2834 }
 0x786   :  { %v1630_v31 = vmul.f32 %v2835_v10, %v2833_v58 }
 0x788   :  { %1697 = vmatmul.mubr.f32.vlgmr.msra.gmra.mrb[14].mxu0 %v1630_v31  ;;  %1768 = vmatmul.mubr.f32.vlgmr.msra.gmra.mrb[30].mxu1 %v1630_v31 }
 0x789   :  { %2626 = vmatpush3.bf16.msra.mxu0 %v2623_v26  ;;  %2035 = vmatprep.mubr.f32.mxu0 %v3212_v0  ;;  %v1820_v0 = vld [vmem:[%s3584_s4 + $0x48] sm:$0xff] }
 0x78a   :  { %2628 = vmatprep.subr.bf16.mxu0 %v2627_v27  ;;  %v2639_v49 = vpack.c.bf16 %v1820_v0, %v1819_v28 }
 0x78d   :  { %2630 = vmatpush3.bf16.msra.mxu0 %v2627_v27 }
 0x78e   :  { %2632 = vmatprep.subr.bf16.mxu0 %v2631_v47 }
 0x791   :  { %2634 = vmatpush3.bf16.msra.mxu0 %v2631_v47 }
 0x792   :  { %2636 = vmatprep.subr.bf16.mxu0 %v2635_v19 }
 0x795   :  { %2638 = vmatpush3.bf16.msra.mxu0 %v2635_v19 }
 0x796   :  { %2640 = vmatprep.subr.bf16.mxu0 %v2639_v49 }
 0x799   :  { %2642 = vmatpush3.bf16.msra.mxu0 %v2639_v49 }
 0x79a   :  { %2644 = vmatprep.subr.bf16.mxu0 %v2643_v54 }
 0x79d   :  { %2646 = vmatpush3.bf16.msra.mxu0 %v2643_v54 }
 0x79e   :  { %2648 = vmatprep.subr.bf16.mxu0 %v2647_v60 }
 0x7a1   :  { %2650 = vmatpush3.bf16.msra.mxu0 %v2647_v60 }
 0x7a2   :  { %2652 = vmatprep.subr.bf16.mxu0 %v2651_v59 }
 0x7a5   :  { %2654 = vmatpush3.bf16.msra.mxu0 %v2651_v59 }
 0x7a8   :  { %2036 = vmatmul.mubr.f32.vlgmr.msra.gmra.mrb[16].mxu0 %v3258_v36 }
 0x7a9   :  { %2038 = vmatprep.mubr.f32.mxu0 %v3304_v24 }
 0x7ac   :  { %2039 = vmatmul.mubr.f32.gmra.mrb[18].mxu0 %v3350_v42 }
 0x7ad   :  { %2041 = vmatprep.mubr.f32.mxu0 %v3396_v30 }
 0x7b0   :  { %2042 = vmatmul.mubr.f32.gmra.mrb[20].mxu0 %v3442_v45 }
 0x7b1   :  { %2044 = vmatprep.mubr.f32.mxu0 %v1630_v31 }
 0x85b   :  { %v1698_v32 = vpop.f32.mrb[14].mxu0  ;;  %v1769_v63 = vpop.f32.mrb[30].mxu1 }
 0x85c   :  { %v1774_v37 = vadd.f32 %v1698_v32, %v3199_v23  ;;  %v1700_v18 = vpop.f32.mrb[15].mxu0  ;;  %v1771_v38 = vpop.f32.mrb[31].mxu1  ;;  %v2701_v42 = vadd.f32 %v1769_v63, %v3203_v5  ;;  %v1978_v5 = vld [vmem:[%s3585_s5] ss:$0 sm:$0xff] }
 0x85d   :  { %v1775_v22 = vadd.f32 %v1700_v18, %v3593_v13  ;;  %v2702_v36 = vadd.f32 %v1771_v38, %v3205_v12 }
 0x85e   :  { %v1975_v26 = vmul.f32 -1.442695, %v1774_v37 }
 0x85f   :  { %v1976_v35 = vmul.f32 -1.442695, %v1775_v22  ;;  %v1977_v24 = vmul.f32 -1.442695, %v2702_v36 }
 0x860   :  { %2836 = vpow2.f32 %v1975_v26 }
 0x861   :  { %2838 = vpow2.f32 %v1976_v35 }
 0x862   :  { %2840 = vpow2.f32 %v1977_v24 }
 0x863   :  { %2842 = vtanh.f32 %v2701_v42 }
 0x86a   :  { %v2837_v30 = vpop.eup %2836 }
 0x86b   :  { %v2839_v45 = vpop.eup %2838  ;;  %v1781_v39 = vadd.f32 1.0, %v2837_v30 }
 0x86c   :  { %v1787_v44 = vadd.f32 1.0, %v2839_v45  ;;  %v2841_v23 = vpop.eup %2840 }
 0x86d   :  { %2844 = vrcp.f32 %v1781_v39  ;;  %v2843_v52 = vpop.eup %2842  ;;  %v1794_v15 = vadd.f32 1.0, %v2841_v23 }
 0x86e   :  { %2846 = vrcp.f32 %v1787_v44 }
 0x86f   :  { %2848 = vrcp.f32 %v1794_v15 }
 0x877   :  { %v2845_v57 = vpop.eup %2844 }
 0x878   :  { %v2847_v1 = vpop.eup %2846  ;;  %v1798_v6 = vmul.f32 %v2845_v57, %v2843_v52 }
 0x879   :  { %v1797_v20 = vmul.f32 %v2847_v1, %v3489_v43  ;;  %v2849_v33 = vpop.eup %2848 }
 0x87b   :  { %v2037_v12 = vpop.f32.mrb[16].mxu0  ;;  %v1799_v29 = vadd.f32 %v1798_v6, %v1797_v20 }
 0x87c   :  { %v1906_v34 = vadd.f32 %v2037_v12, %v1978_v5  ;;  %v1900_v41 = vpop.f32.mrb[17].mxu0 }
 0x87d   :  { %v1901_v61 = vadd.f32 %v1978_v5, %v1900_v41  ;;  %2850 = vtanh.f32 %v1799_v29 }
 0x87e   :  { %1941 = vst.msk [vmem:[%s3586_s6 + $0x8] sm:$0xff] %vm1939_vm0, %v1906_v34 }
 0x87f   :  { %1940 = vst.msk [vmem:[%s3586_s6] sm:$0xff] %vm1939_vm0, %v1901_v61  ;;  %v2040_v62 = vpop.f32.mrb[18].mxu0 }
 0x880   :  { %v1916_v7 = vadd.f32 %v2040_v62, %v1978_v5  ;;  %v1910_v8 = vpop.f32.mrb[19].mxu0 }
 0x881   :  { %v1911_v48 = vadd.f32 %v1978_v5, %v1910_v8 }
 0x882   :  { %1943 = vst.msk [vmem:[%s3586_s6 + $0x18] sm:$0xff] %vm1939_vm0, %v1916_v7 }
 0x883   :  { %1942 = vst.msk [vmem:[%s3586_s6 + $0x10] sm:$0xff] %vm1939_vm0, %v1911_v48  ;;  %v2043_v17 = vpop.f32.mrb[20].mxu0 }
 0x884   :  { %v1926_v56 = vadd.f32 %v2043_v17, %v1978_v5  ;;  %v1920_v25 = vpop.f32.mrb[21].mxu0 }
 0x885   :  { %v1921_v2 = vadd.f32 %v1978_v5, %v1920_v25 }
 0x886   :  { %1945 = vst.msk [vmem:[%s3586_s6 + $0x28] sm:$0xff] %vm1939_vm0, %v1926_v56 }
 0x887   :  { %v2851_v11 = vpop.eup %2850  ;;  %1944 = vst.msk [vmem:[%s3586_s6 + $0x20] sm:$0xff] %vm1939_vm0, %v1921_v2 }
 0x888   :  { %v1801_v43 = vmul.f32 %v2851_v11, %v2849_v33 }
 0x88a   :  { %2045 = vmatmul.mubr.f32.gmra.mrb[22].mxu0 %v1801_v43 }
 0x95d   :  { %v2046_v21 = vpop.f32.mrb[22].mxu0 }
 0x95e   :  { %v1936_v50 = vadd.f32 %v2046_v21, %v1978_v5  ;;  %v1930_v58 = vpop.f32.mrb[23].mxu0 }
 0x95f   :  { %v1931_v10 = vadd.f32 %v1978_v5, %v1930_v58 }
 0x960   :  { %1947 = vst.msk [vmem:[%s3586_s6 + $0x38] sm:$0xff] %vm1939_vm0, %v1936_v50 }
 0x961   :  { %1946 = vst.msk [vmem:[%s3586_s6 + $0x30] sm:$0xff] %vm1939_vm0, %v1931_v10 }
 0x962   :  { %1952 = vsyncpa [#allocation4], 1 }
 0x963   :  { %1953 = vsyncpa [#allocation6], 1 }

</bundles_post_ra>
